<compile_context>
chip_gen: v5e
topology: v5e:2x2
jax: 0.10.0
libtpu: 0.0.40
codegen_flags: <defaults>
</compile_context>

<pallas_src>
import functools
import math

import jax
import jax.numpy as jnp
from jax import lax
from jax.experimental import pallas as pl
from jax.experimental.pallas import tpu as pltpu


def _round_up(x, m):
    return ((x + m - 1) // m) * m


# ---------------------------------------------------------------------------
# Pallas kernel: embedding gather + conv1d (all filter sizes) + ReLU + max-pool + fc
# ---------------------------------------------------------------------------

def _textcnn_kernel(ids_ref, tab_ref, w_ref, b_ref, mask_ref, fcw_ref, fcb_ref,
                    out_ref, *, T: int, max_fs: int):
    """Fused TextCNN1d body for one batch block.

    ids_ref  : (BB, T)            i32  token ids
    tab_ref  : (Vp, E)            f32  embedding table (vocab padded to Vp, pad_idx row = 0)
    w_ref    : (max_fs*E, GFp)    bf16 im2col-packed conv weights (zero for taps k >= fs_i)
    b_ref    : (1, GFp)           f32  packed conv biases (0 in padded columns)
    mask_ref : (T, GFp)           f32  0/1 validity mask (1 iff t <= T - fs_i)
    fcw_ref  : (GFp, OUTp)        f32  fc weight, pre-transposed + lane-padded
    fcb_ref  : (1, OUTp)          f32  fc bias, lane-padded
    out_ref  : (BB, OUTp)         f32  lane-dense output (sliced outside the kernel)
    """
    BB = ids_ref.shape[0]
    Vp = tab_ref.shape[0]
    E = tab_ref.shape[1]
    GFp = w_ref.shape[1]

    # --- embedding gather: exact one-hot MXU matmul against the small table ---------
    ids = ids_ref[...]                                                     # (BB, T) i32
    vocab_iota = lax.broadcasted_iota(jnp.int32, (BB, T, Vp), 2)
    onehot = (ids[:, :, None] == vocab_iota).astype(jnp.float32)           # (BB, T, Vp)
    emb = jnp.dot(onehot.reshape(BB * T, Vp), tab_ref[...],
                  preferred_element_type=jnp.float32).reshape(BB, T, E)

    # Zero time tail (== padding_idx embedding) so every tap window below is in-bounds;
    # those positions only feed zero-weight taps or masked conv positions.
    emb = jnp.concatenate(
        [emb, jnp.zeros((BB, max_fs - 1, E), jnp.float32)], axis=1)        # (BB, Tp, E)

    # --- im2col + ONE conv matmul for all filter sizes (bf16 inputs, f32 accumulate) --
    xcat = jnp.concatenate([emb[:, k:k + T, :] for k in range(max_fs)], axis=2)
    xcat = xcat.reshape(BB * T, max_fs * E).astype(jnp.bfloat16)
    acc = jnp.dot(xcat, w_ref[...], preferred_element_type=jnp.float32)    # (BB*T, GFp)

    # bias + ReLU; zero invalid conv positions (t > T - fs_i) with a 0/1 multiply
    # (exact: ReLU output >= 0, so the max-pool is unchanged); global max-pool over time.
    conv = jnp.maximum(acc.reshape(BB, T, GFp) + b_ref[...], 0.0)
    conv = conv * mask_ref[...][None, :, :]
    pooled = jnp.max(conv, axis=1)                                         # (BB, GFp)

    # self.dropout(cat) is identity in eval mode; fc kept in f32 (tiny).
    out_ref[...] = (jnp.dot(pooled, fcw_ref[...], preferred_element_type=jnp.float32)
                    + fcb_ref[...])


# ---------------------------------------------------------------------------
# Wrapper
# ---------------------------------------------------------------------------

def textcnn_forward(params, text):
    """text: (B, T) int32 token ids -> (B, output_dim) f32 logits."""
    B, T = text.shape
    filter_sizes = params["filter_sizes"]
    F = params["n_filters"]
    max_fs = params["max_fs"]
    GF = len(filter_sizes) * F
    GFp = params["w_im2col"].shape[1]
    OUTp = params["fc_w_pad"].shape[1]
    Vp, E = params["emb_table"].shape

    # Precomputed 0/1 validity mask: column g (filter group i) is valid for t <= T - fs_i;
    # padded columns (g >= GF) always masked (their conv values are 0 anyway).
    col_fs = jnp.concatenate(
        [jnp.full((F,), fs, jnp.int32) for fs in filter_sizes]
        + [jnp.full((GFp - GF,), T + 1, jnp.int32)])
    mask = (jnp.arange(T, dtype=jnp.int32)[:, None] <= (T - col_fs)[None, :]
            ).astype(jnp.float32)                                          # (T, GFp)

    # Single-TC chips (v5e/v6e): one full-batch block (M = B*T rows, no per-step
    # pipeline overhead).  v7x has 2 TensorCores: give each a parallel block.
    # (For large B not a multiple of 8/16, prefer padding B rather than BB = B.)
    try:
        kind = jax.devices()[0].device_kind.lower()
    except Exception:
        kind = ""
    n_blocks = 2 if (("v7" in kind or "7x" in kind) and B % 16 == 0) else 1
    BB = B // n_blocks

    flops = (2 * B * T * Vp * E                  # one-hot gather matmul
             + 2 * B * T * (max_fs * E) * GFp    # im2col conv matmul
             + 2 * B * GFp * OUTp)               # fc
    bytes_accessed = (4 * (B * T + Vp * E + GFp + T * GFp + GFp * OUTp + OUTp + B * OUTp)
                      + 2 * (max_fs * E) * GFp)

    kernel = functools.partial(_textcnn_kernel, T=T, max_fs=max_fs)
    out_padded = pl.pallas_call(
        kernel,
        out_shape=jax.ShapeDtypeStruct((B, OUTp), jnp.float32),
        grid_spec=pltpu.PrefetchScalarGridSpec(
            num_scalar_prefetch=0,
            grid=(n_blocks,),
            in_specs=[
                pl.BlockSpec((BB, T), lambda b: (b, 0)),                # token ids
                pl.BlockSpec((Vp, E), lambda b: (0, 0)),                # padded emb table
                pl.BlockSpec((max_fs * E, GFp), lambda b: (0, 0)),      # im2col conv W (bf16)
                pl.BlockSpec((1, GFp), lambda b: (0, 0)),               # packed conv bias
                pl.BlockSpec((T, GFp), lambda b: (0, 0)),               # validity mask
                pl.BlockSpec((GFp, OUTp), lambda b: (0, 0)),            # fc weight (padded)
                pl.BlockSpec((1, OUTp), lambda b: (0, 0)),              # fc bias (padded)
            ],
            out_specs=pl.BlockSpec((BB, OUTp), lambda b: (b, 0)),
        ),
        compiler_params=pltpu.CompilerParams(
            dimension_semantics=("parallel",)),
        cost_estimate=pl.CostEstimate(flops=flops, transcendentals=0,
                                      bytes_accessed=bytes_accessed),
    )(text.astype(jnp.int32), params["emb_table"], params["w_im2col"],
      params["b_comb"], mask, params["fc_w_pad"], params["fc_b_pad"])

    return out_padded[:, :params["output_dim"]]                            # drop lane padding


# ---------------------------------------------------------------------------
# Deterministic parameter initialization (shapes from TextCNN1d.__init__)
# ---------------------------------------------------------------------------

def init_params(key, vocab_size, embedding_dim, n_filters, filter_sizes,
                output_dim, pad_idx):
    n_fs = len(filter_sizes)
    max_fs = max(filter_sizes)
    E, F = embedding_dim, n_filters
    GF = n_fs * F
    GFp = _round_up(max(GF, 128), 128)           # lane-dense packed conv output dim
    OUTp = _round_up(max(output_dim, 128), 128)  # lane-dense fc output
    Vp = _round_up(vocab_size, 8)                # sublane-aligned embedding table

    keys = jax.random.split(key, 2 * n_fs + 3)
    it = iter(keys)

    # nn.Embedding: N(0, 1) rows; padding_idx row zeroed (and frozen). Padded rows are
    # zero and never indexed.
    emb = jax.random.normal(next(it), (vocab_size, E), jnp.float32)
    emb = emb.at[pad_idx].set(0.0)
    emb_pad = jnp.zeros((Vp, E), jnp.float32).at[:vocab_size].set(emb)

    # Pack every Conv1d weight (F, E, fs) into one im2col weight (max_fs*E, GFp):
    #   w_im2col[k*E + e, i*F + f] = W_i[f, e, k] for k < fs_i, else 0.
    w_im2col = jnp.zeros((max_fs * E, GFp), jnp.float32)
    b_comb = jnp.zeros((1, GFp), jnp.float32)    # padded columns keep bias 0 (exactness)
    ref_convs = []
    for i, fs in enumerate(filter_sizes):
        bound = 1.0 / math.sqrt(E * fs)          # PyTorch Conv1d default U(-k, k)
        w = jax.random.uniform(next(it), (F, E, fs), jnp.float32, -bound, bound)
        b = jax.random.uniform(next(it), (F,), jnp.float32, -bound, bound)
        for k in range(fs):
            w_im2col = w_im2col.at[k * E:(k + 1) * E, i * F:(i + 1) * F].set(w[:, :, k].T)
        b_comb = b_comb.at[0, i * F:(i + 1) * F].set(b)
        ref_convs.append((w, b))

    kf = 1.0 / math.sqrt(GF)                     # PyTorch Linear default
    fc_w = jax.random.uniform(next(it), (output_dim, GF), jnp.float32, -kf, kf)
    fc_b = jax.random.uniform(next(it), (output_dim,), jnp.float32, -kf, kf)
    fc_w_pad = jnp.zeros((GFp, OUTp), jnp.float32).at[:GF, :output_dim].set(fc_w.T)
    fc_b_pad = jnp.zeros((1, OUTp), jnp.float32).at[0, :output_dim].set(fc_b)

    return dict(
        # kernel-side (packed / padded; conv matmul operand in bf16)
        emb_table=emb_pad, w_im2col=w_im2col.astype(jnp.bfloat16),
        b_comb=b_comb, fc_w_pad=fc_w_pad, fc_b_pad=fc_b_pad,
        # metadata
        filter_sizes=tuple(filter_sizes), n_filters=n_filters,
        output_dim=output_dim, max_fs=max_fs,
        # reference-side (original f32 weights, torch layout)
        ref_emb=emb, ref_convs=ref_convs, ref_fc_w=fc_w, ref_fc_b=fc_b)


# ---------------------------------------------------------------------------
# Pure-JAX reference (mirrors the PyTorch forward, f32) for a correctness check
# ---------------------------------------------------------------------------

def _reference_forward(params, text):
    emb = params["ref_emb"][text]                          # (B, T, E)
    T = emb.shape[1]
    hi = lax.Precision.HIGHEST
    pooled = []
    for (w, b), fs in zip(params["ref_convs"], params["filter_sizes"]):
        t_out = T - fs + 1
        conv = b + sum(jnp.einsum("bte,fe->btf", emb[:, k:k + t_out, :], w[:, :, k],
                                  precision=hi) for k in range(fs))
        pooled.append(jnp.max(jax.nn.relu(conv), axis=1))
    cat = jnp.concatenate(pooled, axis=1)                  # dropout = identity (eval)
    return jnp.dot(cat, params["ref_fc_w"].T, precision=hi) + params["ref_fc_b"]


# ---------------------------------------------------------------------------
# Main
# ---------------------------------------------------------------------------

if __name__ == "__main__":
    VOCAB = 50
    EMB = 64                 # embedding_dim
    N_FILTERS = 32
    FILTER_SIZES = (3, 4, 5)
    OUT = 4                  # output_dim
    PAD_IDX = 0
    B, T = 16, 16            # batch, sequence length

    key = jax.random.PRNGKey(0)
    k_param, k_text = jax.random.split(key)

    params = init_params(k_param, VOCAB, EMB, N_FILTERS, FILTER_SIZES, OUT, PAD_IDX)
    text = jax.random.randint(k_text, (B, T), 0, VOCAB, dtype=jnp.int32)

    out = textcnn_forward(params, text)
    out = jax.block_until_ready(out)
    assert out.shape == (B, OUT) and out.dtype == jnp.float32

    ref = _reference_forward(params, text)
    # bf16 conv-matmul inputs (f32 accumulation) vs f32 reference -> small relative error
    assert jnp.allclose(out, ref, atol=3e-2, rtol=3e-2), "Pallas kernel mismatch vs reference"

    print("KERNEL_OK")
</pallas_src>

<mosaic_0001>
module attributes {stable_mosaic.version = 11 : i64} {
  func.func @_textcnn_kernel(%arg0: i32, %arg1: memref<16x16xi32, #tpu.memory_space<vmem>>, %arg2: memref<56x64xf32, #tpu.memory_space<vmem>>, %arg3: memref<320x128xbf16, #tpu.memory_space<vmem>>, %arg4: memref<1x128xf32, #tpu.memory_space<vmem>>, %arg5: memref<16x128xf32, #tpu.memory_space<vmem>>, %arg6: memref<128x128xf32, #tpu.memory_space<vmem>>, %arg7: memref<1x128xf32, #tpu.memory_space<vmem>>, %arg8: memref<16x128xf32, #tpu.memory_space<vmem>>) attributes {dimension_semantics = [#tpu.dimension_semantics<parallel>], iteration_bounds = array<i64: 1>, scalar_prefetch = 0 : i64, scratch_operands = 0 : i64, tpu.core_type = #tpu.core_type<tc>, window_params = [{transform_indices = @transform_0, window_bounds = array<i64: 16, 16>}, {pipeline_mode = #tpu.pipeline_mode<synchronous>, transform_indices = @transform_1, window_bounds = array<i64: 56, 64>}, {pipeline_mode = #tpu.pipeline_mode<synchronous>, transform_indices = @transform_2, window_bounds = array<i64: 320, 128>}, {pipeline_mode = #tpu.pipeline_mode<synchronous>, transform_indices = @transform_3, window_bounds = array<i64: 1, 128>}, {pipeline_mode = #tpu.pipeline_mode<synchronous>, transform_indices = @transform_4, window_bounds = array<i64: 16, 128>}, {pipeline_mode = #tpu.pipeline_mode<synchronous>, transform_indices = @transform_5, window_bounds = array<i64: 128, 128>}, {pipeline_mode = #tpu.pipeline_mode<synchronous>, transform_indices = @transform_6, window_bounds = array<i64: 1, 128>}, {transform_indices = @transform_7, window_bounds = array<i64: 16, 128>}]} {
    %c0 = arith.constant 0 : index
    %c0_0 = arith.constant 0 : index
    %0 = vector.load %arg1[%c0, %c0_0] : memref<16x16xi32, #tpu.memory_space<vmem>>, vector<16x16xi32>
    %1 = tpu.iota {dimensions = array<i32: 2>} : vector<16x16x56xi32>
    %2 = vector.shape_cast %0 : vector<16x16xi32> to vector<16x16x1xi32>
    %3 = vector.broadcast %2 : vector<16x16x1xi32> to vector<16x16x56xi32>
    %4 = arith.cmpi eq, %3, %1 : vector<16x16x56xi32>
    %5 = arith.extui %4 : vector<16x16x56xi1> to vector<16x16x56xi32>
    %6 = arith.sitofp %5 : vector<16x16x56xi32> to vector<16x16x56xf32>
    %7 = vector.shape_cast %6 : vector<16x16x56xf32> to vector<256x56xf32>
    %c0_1 = arith.constant 0 : index
    %c0_2 = arith.constant 0 : index
    %8 = vector.load %arg2[%c0_1, %c0_2] : memref<56x64xf32, #tpu.memory_space<vmem>>, vector<56x64xf32>
    %cst = arith.constant dense<0.000000e+00> : vector<256x64xf32>
    %9 = tpu.matmul %7, %8, %cst {dimension_numbers = #tpu.dot_dimension_numbers<[1], [0], [0], [1], [0, 0, 1, 1], [], []>} : vector<256x56xf32>, vector<56x64xf32>, vector<256x64xf32> -> vector<256x64xf32>
    %10 = vector.shape_cast %9 : vector<256x64xf32> to vector<16x16x64xf32>
    %cst_3 = arith.constant 0.000000e+00 : f32
    %11 = vector.broadcast %cst_3 : f32 to vector<16x4x64xf32>
    %12 = tpu.concatenate %10, %11 in 1 : vector<16x16x64xf32>, vector<16x4x64xf32> -> vector<16x20x64xf32>
    %13 = vector.extract_strided_slice %12 {offsets = [0, 0, 0], sizes = [16, 16, 64], strides = [1, 1, 1]} : vector<16x20x64xf32> to vector<16x16x64xf32>
    %14 = vector.extract_strided_slice %12 {offsets = [0, 1, 0], sizes = [16, 16, 64], strides = [1, 1, 1]} : vector<16x20x64xf32> to vector<16x16x64xf32>
    %15 = vector.extract_strided_slice %12 {offsets = [0, 2, 0], sizes = [16, 16, 64], strides = [1, 1, 1]} : vector<16x20x64xf32> to vector<16x16x64xf32>
    %16 = vector.extract_strided_slice %12 {offsets = [0, 3, 0], sizes = [16, 16, 64], strides = [1, 1, 1]} : vector<16x20x64xf32> to vector<16x16x64xf32>
    %17 = vector.extract_strided_slice %12 {offsets = [0, 4, 0], sizes = [16, 16, 64], strides = [1, 1, 1]} : vector<16x20x64xf32> to vector<16x16x64xf32>
    %18 = tpu.concatenate %13, %14, %15, %16, %17 in 2 : vector<16x16x64xf32>, vector<16x16x64xf32>, vector<16x16x64xf32>, vector<16x16x64xf32>, vector<16x16x64xf32> -> vector<16x16x320xf32>
    %19 = vector.shape_cast %18 : vector<16x16x320xf32> to vector<256x320xf32>
    %20 = arith.truncf %19 : vector<256x320xf32> to vector<256x320xbf16>
    %c0_4 = arith.constant 0 : index
    %c0_5 = arith.constant 0 : index
    %21 = vector.load %arg3[%c0_4, %c0_5] : memref<320x128xbf16, #tpu.memory_space<vmem>>, vector<320x128xbf16>
    %cst_6 = arith.constant dense<0.000000e+00> : vector<256x128xf32>
    %22 = tpu.matmul %20, %21, %cst_6 {dimension_numbers = #tpu.dot_dimension_numbers<[1], [0], [0], [1], [0, 0, 1, 1], [], []>} : vector<256x320xbf16>, vector<320x128xbf16>, vector<256x128xf32> -> vector<256x128xf32>
    %23 = vector.shape_cast %22 : vector<256x128xf32> to vector<16x16x128xf32>
    %c0_7 = arith.constant 0 : index
    %c0_8 = arith.constant 0 : index
    %24 = vector.load %arg4[%c0_7, %c0_8] : memref<1x128xf32, #tpu.memory_space<vmem>>, vector<1x128xf32>
    %25 = vector.shape_cast %24 : vector<1x128xf32> to vector<1x1x128xf32>
    %26 = vector.broadcast %25 : vector<1x1x128xf32> to vector<16x16x128xf32>
    %27 = arith.addf %23, %26 : vector<16x16x128xf32>
    %cst_9 = arith.constant 0.000000e+00 : f32
    %28 = vector.broadcast %cst_9 : f32 to vector<16x16x128xf32>
    %29 = arith.maximumf %27, %28 : vector<16x16x128xf32>
    %c0_10 = arith.constant 0 : index
    %c0_11 = arith.constant 0 : index
    %30 = vector.load %arg5[%c0_10, %c0_11] : memref<16x128xf32, #tpu.memory_space<vmem>>, vector<16x128xf32>
    %31 = vector.shape_cast %30 : vector<16x128xf32> to vector<1x16x128xf32>
    %32 = vector.broadcast %31 : vector<1x16x128xf32> to vector<16x16x128xf32>
    %33 = arith.mulf %29, %32 : vector<16x16x128xf32>
    %cst_12 = arith.constant dense<0xFF800000> : vector<16x128xf32>
    %34 = vector.multi_reduction <maximumf>, %33, %cst_12 [1] : vector<16x16x128xf32> to vector<16x128xf32>
    %c0_13 = arith.constant 0 : index
    %c0_14 = arith.constant 0 : index
    %35 = vector.load %arg6[%c0_13, %c0_14] : memref<128x128xf32, #tpu.memory_space<vmem>>, vector<128x128xf32>
    %cst_15 = arith.constant dense<0.000000e+00> : vector<16x128xf32>
    %36 = tpu.matmul %34, %35, %cst_15 {dimension_numbers = #tpu.dot_dimension_numbers<[1], [0], [0], [1], [0, 0, 1, 1], [], []>} : vector<16x128xf32>, vector<128x128xf32>, vector<16x128xf32> -> vector<16x128xf32>
    %c0_16 = arith.constant 0 : index
    %c0_17 = arith.constant 0 : index
    %37 = vector.load %arg7[%c0_16, %c0_17] : memref<1x128xf32, #tpu.memory_space<vmem>>, vector<1x128xf32>
    %38 = vector.broadcast %37 : vector<1x128xf32> to vector<16x128xf32>
    %39 = arith.addf %36, %38 : vector<16x128xf32>
    %c0_18 = arith.constant 0 : index
    %c0_19 = arith.constant 0 : index
    %40 = vector.load %arg8[%c0_18, %c0_19] : memref<16x128xf32, #tpu.memory_space<vmem>>, vector<16x128xf32>
    tpu.vector_store %arg8[%c0_18, %c0_19], %39 {strides = array<i32>} : memref<16x128xf32, #tpu.memory_space<vmem>>, vector<16x128xf32>,
    return
  }
  func.func @transform_0(%arg0: i32) -> (i32, i32) {
    %c0_i32 = arith.constant 0 : i32
    %c0_i32_0 = arith.constant 0 : i32
    return %arg0, %c0_i32 : i32, i32
  }
  func.func @transform_1(%arg0: i32) -> (i32, i32) {
    %c0_i32 = arith.constant 0 : i32
    %c0_i32_0 = arith.constant 0 : i32
    %c0_i32_1 = arith.constant 0 : i32
    return %c0_i32, %c0_i32_0 : i32, i32
  }
  func.func @transform_2(%arg0: i32) -> (i32, i32) {
    %c0_i32 = arith.constant 0 : i32
    %c0_i32_0 = arith.constant 0 : i32
    %c0_i32_1 = arith.constant 0 : i32
    return %c0_i32, %c0_i32_0 : i32, i32
  }
  func.func @transform_3(%arg0: i32) -> (i32, i32) {
    %c0_i32 = arith.constant 0 : i32
    %c0_i32_0 = arith.constant 0 : i32
    %c0_i32_1 = arith.constant 0 : i32
    return %c0_i32, %c0_i32_0 : i32, i32
  }
  func.func @transform_4(%arg0: i32) -> (i32, i32) {
    %c0_i32 = arith.constant 0 : i32
    %c0_i32_0 = arith.constant 0 : i32
    %c0_i32_1 = arith.constant 0 : i32
    return %c0_i32, %c0_i32_0 : i32, i32
  }
  func.func @transform_5(%arg0: i32) -> (i32, i32) {
    %c0_i32 = arith.constant 0 : i32
    %c0_i32_0 = arith.constant 0 : i32
    %c0_i32_1 = arith.constant 0 : i32
    return %c0_i32, %c0_i32_0 : i32, i32
  }
  func.func @transform_6(%arg0: i32) -> (i32, i32) {
    %c0_i32 = arith.constant 0 : i32
    %c0_i32_0 = arith.constant 0 : i32
    %c0_i32_1 = arith.constant 0 : i32
    return %c0_i32, %c0_i32_0 : i32, i32
  }
  func.func @transform_7(%arg0: i32) -> (i32, i32) {
    %c0_i32 = arith.constant 0 : i32
    %c0_i32_0 = arith.constant 0 : i32
    return %arg0, %c0_i32 : i32, i32
  }
}

</mosaic_0001>

<bundles_post_ra>
// kernel: tpu_custom_call.1
= control target key start
LH: loop header
LB: loop body
LE: loop exit
PB: predicated region body
PF: predicated region fallthrough
CT: control target
= control target key end

     0   :  { %12 = vsyncpa [#allocation3], 0  ;;  %s3494_s0 = inlined_call_operand.hbm [shape: s32[16,16], index: 0, kind: input, shape index: {}]   ;;  %s3495_s1 = inlined_call_operand.hbm [shape: f32[56,64], index: 1, kind: input, shape index: {}]   ;;  %s3496_s2 = inlined_call_operand.hbm [shape: bf16[320,128], index: 2, kind: input, shape index: {}]   ;;  %s3497_s3 = inlined_call_operand.vmem [shape: f32[1,128], index: 3, kind: input, shape index: {}]   ;;  %s3498_s4 = inlined_call_operand.hbm [shape: f32[16,128], index: 4, kind: input, shape index: {}]   ;;  %s3499_s5 = inlined_call_operand.hbm [shape: f32[128,128], index: 5, kind: input, shape index: {}]   ;;  %s3500_s6 = inlined_call_operand.vmem [shape: f32[1,128], index: 6, kind: input, shape index: {}]   ;;  %s3501_s7 = inlined_call_operand.hbm [shape: f32[16,128], index: 7, kind: output, shape index: {}]  }
   0x1   :  { %13 = vsyncpa [#allocation6], 0 }
   0x2   :  { %14 = vsyncpa [#allocation9], 0 }
   0x3   :  { %15 = vsyncpa [#allocation4], 0  ;;  %s33_s26 = sshll.u32 %s3495_s1, 4  ;;  %s2620_s27 = smov [#allocation5]   ;;  %s34_s26 = int_to_ptr.hbm [resolvable:$true] %s33_s26 }
   0x4   :  { %s35_s28 = sshll.u32 %s2620_s27, 4  ;;  %s61_s8 = sshll.u32 %s3498_s4, 4  ;;  %s36_s28 = int_to_ptr.vmem [resolvable:$true] %s35_s28  ;;  %s62_s8 = int_to_ptr.hbm [resolvable:$true] %s61_s8 }
   0x5   :  { %s2621_s9 = smov 128   ;;  %s2622_s10 = smov 8  }
   0x6   :  { %41 = dma.hbm_to_vmem [thread:$0]  %s34_s26, 896, %s36_s28, [#allocation6], %s2621_s9, %s2621_s9, %s2622_s10  }
   0x7   :  { %s2623_s11 = smov [#allocation8]   ;;  %s20_s1 = sshll.u32 %s3494_s0, 4  ;;  %s21_s1 = int_to_ptr.hbm [resolvable:$true] %s20_s1 }
   0x8   :  { %s63_s12 = sshll.u32 %s2623_s11, 4  ;;  %s46_s16 = sshll.u32 %s3496_s2, 4  ;;  %s64_s12 = int_to_ptr.vmem [resolvable:$true] %s63_s12  ;;  %s47_s16 = int_to_ptr.hbm [resolvable:$true] %s46_s16 }
   0x9   :  { %69 = dma.hbm_to_vmem [thread:$0]  %s62_s8, 256, %s64_s12, [#allocation9], %s2621_s9, %s2621_s9, %s2622_s10  }
   0xa   :  { %s2624_s17 = smov [#allocation2]   ;;  %s2625_s19 = smov [#allocation7]  }
   0xb   :  { %s22_s18 = sshll.u32 %s2624_s17, 4  ;;  %s48_s0 = sshll.u32 %s2625_s19, 4  ;;  %s23_s18 = int_to_ptr.vmem [resolvable:$true] %s22_s18  ;;  %s49_s0 = int_to_ptr.vmem [resolvable:$true] %s48_s0 }
   0xc   :  { %28 = dma.hbm_to_vmem [thread:$0]  %s21_s1, 256, %s23_s18, [#allocation3], %s2621_s9, %s2621_s9, %s2622_s10  }
   0xd   :  { %s2626_s20 = smov 64   ;;  %s2627_s21 = smov 4  }
   0xe   :  { %54 = dma.hbm_to_vmem [thread:$0]  %s47_s16, 2560, %s49_s0, [#allocation6], %s2626_s20, %s2626_s20, %s2627_s21  }
   0xf   :  { %s74_s2 = sshll.u32 %s3499_s5, 4  ;;  %s2628_s24 = smov [#allocation10]   ;;  %s75_s2 = int_to_ptr.hbm [resolvable:$true] %s74_s2 }
  0x10   :  { %s76_s25 = sshll.u32 %s2628_s24, 4  ;;  %s77_s25 = int_to_ptr.vmem [resolvable:$true] %s76_s25 }
  0x11   :  { %82 = dma.hbm_to_vmem [thread:$0]  %s75_s2, 2048, %s77_s25, [#allocation9], %s2621_s9, %s2621_s9, %s2622_s10  }
  0x12   :  { %2612 = dma.done.wait [#allocation3], 256  }
  0x13   :  { %2613 = vsyncadd [#allocation3], 4294967040 }
  0x14   :  { %2614 = dma.done.wait [#allocation6], 3456  }
  0x15   :  { %2615 = vsyncadd [#allocation6], 4294963840 }
  0x16   :  { %2616 = dma.done.wait [#allocation9], 2304  }
  0x17   :  { %2617 = vsyncadd [#allocation9], 4294964992  ;;  %v108_v0 = vlaneseq  ;;  %v106_v2 = vld [vmem:[#allocation2] sm:$0xff]  ;;  %v419_v9 = vld [vmem:[#allocation5 + $0x28] sm:$0xff]  ;;  %vm421_vm0 = vcmask 457728   ;;  %v2629_v23 = vmov 0.0  }
  0x18   :  { %v110_v3 = vperm.slane %v106_v2, 0  ;;  %v123_v4 = vperm.slane %v106_v2, 1  ;;  %v136_v5 = vperm.slane %v106_v2, 2  ;;  %v149_v7 = vperm.slane %v106_v2, 3  ;;  %v420_v8 = vld [vmem:[#allocation5 + $0x30] sm:$0xff]  ;;  %v418_v10 = vld [vmem:[#allocation5 + $0x20] sm:$0xff] }
  0x19   :  { %v2700_v1 = vshrl.u32 %v108_v0, 7  ;;  %527 = vmatpush.msra.mxu0 %v420_v8  ;;  %v162_v11 = vperm.slane %v106_v2, 4  ;;  %v417_v12 = vld [vmem:[#allocation5 + $0x18] sm:$0xff]  ;;  %v416_v13 = vld [vmem:[#allocation5 + $0x10] sm:$0xff]  ;;  %v415_v14 = vld [vmem:[#allocation5 + $0x8] sm:$0xff]  ;;  %v175_v15 = vperm.slane %v106_v2, 5 }
  0x1a   :  { %v188_v16 = vperm.slane %v106_v2, 6  ;;  %v414_v17 = vld [vmem:[#allocation5] sm:$0xff]  ;;  %v201_v18 = vperm.slane %v106_v2, 7  ;;  %v2719_v19 = vld [vmem:[#allocation2 + $0x8] sm:$0xff]  ;;  %v2722_v21 = vand.u32 127, %v108_v0  ;;  %v2270_v51 = vld [vmem:[#allocation7 + $0x98] sm:$0xff] }
  0x1b   :  { %2282 = vset.pattern.permute.xlu0 %v2700_v1  ;;  %2284 = vset.pattern.permute.xlu1 %v2700_v1  ;;  %v2706_v6 = vadd.s32 8, %v2700_v1  ;;  %v214_v20 = vperm.slane %v2719_v19, 0  ;;  %v227_v25 = vperm.slane %v2719_v19, 1  ;;  %v240_v31 = vperm.slane %v2719_v19, 2  ;;  %v2269_v53 = vld [vmem:[#allocation7 + $0x90] sm:$0xff]  ;;  %v2268_v55 = vld [vmem:[#allocation7 + $0x88] sm:$0xff] }
  0x1c   :  { %2286 = vset.pattern.permute.xlu2 %v2700_v1  ;;  %528 = vmatpush.msra.mxu0 %v419_v9  ;;  %v253_v35 = vperm.slane %v2719_v19, 3  ;;  %v2267_v57 = vld [vmem:[#allocation7 + $0x80] sm:$0xff]  ;;  %v2796_v9 = vrot.slane %v2629_v23, 1  ;;  %s2076_s12 = sshll.u32 %s3501_s7, 4  ;;  %s2077_s12 = int_to_ptr.hbm [resolvable:$true] %s2076_s12 }
  0x1d   :  { %1687 = vmatpush.bf16.msra.mxu3 %v2270_v51 }
  0x1e   :  { %529 = vmatpush.msra.mxu0 %v418_v10 }
  0x20   :  { %530 = vmatpush.msra.mxu0 %v417_v12 }
  0x21   :  { %1688 = vmatpush.bf16.msra.mxu3 %v2269_v53 }
  0x22   :  { %531 = vmatpush.msra.mxu0 %v416_v13 }
  0x23   :  { %115 = vperm.xlu0 %2282, %v110_v3   ;;  %128 = vperm.xlu1 %2284, %v123_v4  }
  0x24   :  { %141 = vperm.xlu2 %2286, %v136_v5   ;;  %532 = vmatpush.msra.mxu0 %v415_v14 }
  0x25   :  { %1689 = vmatpush.bf16.msra.mxu3 %v2268_v55 }
  0x26   :  { %533 = vmatpush.msra.mxu0 %v414_v17 }
  0x29   :  { %1690 = vmatpush.bf16.msra.mxu3 %v2267_v57 }
  0x2b   :  { %2283 = vset.pattern.permute.xlu0 %v2706_v6  ;;  %2285 = vset.pattern.permute.xlu1 %v2706_v6 }
  0x2c   :  { %2287 = vset.pattern.permute.xlu2 %v2706_v6 }
  0x33   :  { %121 = vperm.xlu0 %2283, %v110_v3   ;;  %134 = vperm.xlu1 %2285, %v123_v4   ;;  %v2787_v4 = vrot.slane %v2629_v23, 4 }
  0x34   :  { %147 = vperm.xlu2 %2287, %v136_v5   ;;  %v2790_v5 = vrot.slane %v2629_v23, 3 }
  0x3b   :  { %2288 = vset.pattern.permute.xlu1 %v2700_v1  ;;  %2289 = vset.pattern.permute.xlu0 %v2700_v1 }
  0x3c   :  { %160 = vperm.xlu2 %2287, %v149_v7  }
  0x43   :  { %154 = vperm.xlu1 %2288, %v149_v7   ;;  %167 = vperm.xlu0 %2289, %v162_v11  }
  0x44   :  { %2291 = vset.pattern.permute.xlu2 %v2700_v1 }
  0x4b   :  { %2290 = vset.pattern.permute.xlu1 %v2706_v6  ;;  %2292 = vset.pattern.permute.xlu0 %v2706_v6 }
  0x4c   :  { %180 = vperm.xlu2 %2291, %v175_v15  }
  0x53   :  { %173 = vperm.xlu1 %2290, %v162_v11   ;;  %199 = vperm.xlu0 %2292, %v188_v16  }
  0x54   :  { %193 = vperm.xlu2 %2291, %v188_v16  }
  0x5b   :  { %186 = vperm.xlu1 %2290, %v175_v15   ;;  %2295 = vset.pattern.permute.xlu0 %v2700_v1 }
  0x5c   :  { %2294 = vset.pattern.permute.xlu2 %v2706_v6 }
  0x63   :  { %2293 = vset.pattern.permute.xlu1 %v2700_v1  ;;  %232 = vperm.xlu0 %2295, %v227_v25  }
  0x64   :  { %212 = vperm.xlu2 %2294, %v201_v18  }
  0x6b   :  { %206 = vperm.xlu1 %2293, %v201_v18  }
  0x6c   :  { %225 = vperm.xlu2 %2294, %v214_v20  }
  0x73   :  { %219 = vperm.xlu1 %2293, %v214_v20  }
  0x74   :  { %2297 = vset.pattern.permute.xlu2 %v2700_v1 }
  0x7b   :  { %2296 = vset.pattern.permute.xlu1 %v2706_v6 }
  0x7c   :  { %245 = vperm.xlu2 %2297, %v240_v31  }
  0x7e   :  { %v142_v33 = vpop.permute.xlu2 %141 }
  0x7f   :  { %vm322_vm5 = vcmp.eq.s32.totalorder %v142_v33, %v2722_v21 }
  0x80   :  { %v2095_v34 = vsel %vm322_vm5, 1.0, %v2629_v23  ;;  %vm924_vm5 = vcmask 1044480  }
  0x83   :  { %238 = vperm.xlu1 %2296, %v227_v25  }
  0x84   :  { %258 = vperm.xlu2 %2297, %v253_v35  }
  0x8b   :  { %251 = vperm.xlu1 %2296, %v240_v31  }
  0x8c   :  { %2313 = vset.pattern.permute.xlu2 %v2706_v6 }
  0x8e   :  { %v148_v36 = vpop.permute.xlu2 %147 }
  0x8f   :  { %vm323_vm6 = vcmp.eq.s32.totalorder %v148_v36, %v2722_v21 }
  0x90   :  { %v2096_v37 = vsel %vm323_vm6, 1.0, %v2629_v23  ;;  %vm664_vm6 = vcmask 1046528  }
  0x93   :  { %264 = vperm.xlu1 %2296, %v253_v35  }
  0x95   :  { %v116_v22 = vpop.permute.xlu0 %115  ;;  %v129_v27 = vpop.permute.xlu1 %128 }
  0x96   :  { %vm318_vm1 = vcmp.eq.s32.totalorder %v116_v22, %v2722_v21  ;;  %vm320_vm3 = vcmp.eq.s32.totalorder %v129_v27, %v2722_v21  ;;  %v161_v40 = vpop.permute.xlu2 %160 }
  0x97   :  { %v2091_v24 = vsel %vm318_vm1, 1.0, %v2629_v23  ;;  %v2093_v29 = vsel %vm320_vm3, 1.0, %v2629_v23  ;;  %vm325_vm8 = vcmp.eq.s32.totalorder %v161_v40, %v2722_v21 }
  0x98   :  { %2123 = vmatmul.msk.f32.vlgmr.msra.gmra.mxu0 %vm421_vm0, %v2091_v24  ;;  %v2098_v41 = vsel %vm325_vm8, 1.0, %v2629_v23 }
  0x9b   :  { %2319 = vset.pattern.permute.xlu1 %v2700_v1 }
  0xa5   :  { %v122_v26 = vpop.permute.xlu0 %121  ;;  %v135_v30 = vpop.permute.xlu1 %134 }
  0xa6   :  { %vm319_vm2 = vcmp.eq.s32.totalorder %v122_v26, %v2722_v21  ;;  %vm321_vm4 = vcmp.eq.s32.totalorder %v135_v30, %v2722_v21  ;;  %v181_v46 = vpop.permute.xlu2 %180  ;;  %v266_v30 = vperm.slane %v2719_v19, 4 }
  0xa7   :  { %v2092_v28 = vsel %vm319_vm2, 1.0, %v2629_v23  ;;  %v2094_v32 = vsel %vm321_vm4, 1.0, %v2629_v23  ;;  %vm328_vm11 = vcmp.eq.s32.totalorder %v181_v46, %v2722_v21  ;;  %vm1086_vm4 = vcmask 1043456  }
  0xa8   :  { %2124 = vmatmul.msk.f32.gmra.mxu0 %vm421_vm0, %v2092_v28  ;;  %v2101_v47 = vsel %vm328_vm11, 1.0, %v2629_v23 }
  0xae   :  { %v194_v50 = vpop.permute.xlu2 %193 }
  0xaf   :  { %vm330_vm13 = vcmp.eq.s32.totalorder %v194_v50, %v2722_v21 }
  0xb0   :  { %2125 = vmatmul.msk.f32.gmra.mxu0 %vm421_vm0, %v2093_v29  ;;  %v2103_v52 = vsel %vm330_vm13, 1.0, %v2629_v23 }
  0xb5   :  { %v155_v38 = vpop.permute.xlu1 %154  ;;  %v168_v42 = vpop.permute.xlu0 %167 }
  0xb6   :  { %vm324_vm7 = vcmp.eq.s32.totalorder %v155_v38, %v2722_v21  ;;  %vm326_vm9 = vcmp.eq.s32.totalorder %v168_v42, %v2722_v21 }
  0xb7   :  { %v2097_v39 = vsel %vm324_vm7, 1.0, %v2629_v23  ;;  %v2099_v43 = vsel %vm326_vm9, 1.0, %v2629_v23  ;;  %vm1184_vm7 = vcmask 523264  }
  0xb8   :  { %2126 = vmatmul.msk.f32.gmra.mxu0 %vm421_vm0, %v2094_v32 }
  0xbe   :  { %v213_v60 = vpop.permute.xlu2 %212 }
  0xbf   :  { %vm333_vm1 = vcmp.eq.s32.totalorder %v213_v60, %v2722_v21 }
  0xc0   :  { %2127 = vmatmul.msk.f32.gmra.mxu0 %vm421_vm0, %v2095_v34  ;;  %v2106_v61 = vsel %vm333_vm1, 1.0, %v2629_v23 }
  0xc5   :  { %v174_v44 = vpop.permute.xlu1 %173  ;;  %v200_v54 = vpop.permute.xlu0 %199 }
  0xc6   :  { %vm327_vm10 = vcmp.eq.s32.totalorder %v174_v44, %v2722_v21  ;;  %vm331_vm14 = vcmp.eq.s32.totalorder %v200_v54, %v2722_v21  ;;  %v226_v2 = vpop.permute.xlu2 %225 }
  0xc7   :  { %v2100_v45 = vsel %vm327_vm10, 1.0, %v2629_v23  ;;  %v2104_v56 = vsel %vm331_vm14, 1.0, %v2629_v23  ;;  %vm335_vm3 = vcmp.eq.s32.totalorder %v226_v2, %v2722_v21  ;;  %vm826_vm14 = vcmask 1045504  }
  0xc8   :  { %2128 = vmatmul.msk.f32.gmra.mxu0 %vm421_vm0, %v2096_v37  ;;  %v2108_v3 = vsel %vm335_vm3, 1.0, %v2629_v23 }
  0xcd   :  { %v187_v48 = vpop.permute.xlu1 %186 }
  0xce   :  { %vm329_vm12 = vcmp.eq.s32.totalorder %v187_v48, %v2722_v21 }
  0xcf   :  { %v2102_v49 = vsel %vm329_vm12, 1.0, %v2629_v23 }
  0xd0   :  { %2129 = vmatmul.msk.f32.gmra.mxu0 %vm421_vm0, %v2097_v39 }
  0xd5   :  { %v233_v15 = vpop.permute.xlu0 %232 }
  0xd6   :  { %vm336_vm8 = vcmp.eq.s32.totalorder %v233_v15, %v2722_v21  ;;  %v246_v40 = vpop.permute.xlu2 %245 }
  0xd7   :  { %v2109_v29 = vsel %vm336_vm8, 1.0, %v2629_v23  ;;  %vm338_vm10 = vcmp.eq.s32.totalorder %v246_v40, %v2722_v21 }
  0xd8   :  { %2130 = vmatmul.msk.f32.gmra.mxu0 %vm421_vm0, %v2098_v41  ;;  %v2111_v50 = vsel %vm338_vm10, 1.0, %v2629_v23 }
  0xdd   :  { %v207_v58 = vpop.permute.xlu1 %206 }
  0xde   :  { %vm332_vm15 = vcmp.eq.s32.totalorder %v207_v58, %v2722_v21 }
  0xdf   :  { %v2105_v59 = vsel %vm332_vm15, 1.0, %v2629_v23 }
  0xe0   :  { %2131 = vmatmul.msk.f32.gmra.mxu0 %vm421_vm0, %v2099_v43 }
  0xe5   :  { %v220_v62 = vpop.permute.xlu1 %219 }
  0xe6   :  { %vm334_vm2 = vcmp.eq.s32.totalorder %v220_v62, %v2722_v21 }
  0xe7   :  { %v2107_v0 = vsel %vm334_vm2, 1.0, %v2629_v23 }
  0xe8   :  { %2132 = vmatmul.msk.f32.gmra.mxu0 %vm421_vm0, %v2100_v45 }
  0xf0   :  { %2133 = vmatmul.msk.f32.gmra.mxu0 %vm421_vm0, %v2101_v47 }
  0xf5   :  { %v239_v31 = vpop.permute.xlu1 %238 }
  0xf6   :  { %vm337_vm9 = vcmp.eq.s32.totalorder %v239_v31, %v2722_v21 }
  0xf7   :  { %v2110_v32 = vsel %vm337_vm9, 1.0, %v2629_v23 }
  0xf8   :  { %2134 = vmatmul.msk.f32.gmra.mxu0 %vm421_vm0, %v2102_v49 }
  0xfd   :  { %v252_v53 = vpop.permute.xlu1 %251 }
  0xfe   :  { %vm339_vm11 = vcmp.eq.s32.totalorder %v252_v53, %v2722_v21 }
  0xff   :  { %v2112_v54 = vsel %vm339_vm11, 1.0, %v2629_v23 }
 0x100   :  { %2135 = vmatmul.msk.f32.gmra.mxu0 %vm421_vm0, %v2103_v52  ;;  %v279_v52 = vperm.slane %v2719_v19, 5 }
 0x108   :  { %2136 = vmatmul.msk.f32.gmra.mxu0 %vm421_vm0, %v2104_v56 }
 0x110   :  { %2137 = vmatmul.msk.f32.gmra.mxu0 %vm421_vm0, %v2105_v59 }
 0x115   :  { %v2780_v63 = vpop.f32.mrf.mxu0 }
 0x116   :  { %v1087_v8 = vrot.slane %v2780_v63, 4  ;;  %v925_v11 = vrot.slane %v2780_v63, 3  ;;  %v665_v14 = vrot.slane %v2780_v63, 1 }
 0x118   :  { %2138 = vmatmul.msk.f32.gmra.mxu0 %vm421_vm0, %v2106_v61  ;;  %v259_v61 = vpop.permute.xlu2 %258 }
 0x119   :  { %vm340_vm12 = vcmp.eq.s32.totalorder %v259_v61, %v2722_v21 }
 0x11a   :  { %v2113_v15 = vsel %vm340_vm12, 1.0, %v2629_v23  ;;  %vm2030_vm12 = vcmask 1045509  }
 0x120   :  { %2139 = vmatmul.msk.f32.gmra.mxu0 %vm421_vm0, %v2107_v0 }
 0x125   :  { %v2792_v7 = vpop.f32.mrf.mxu0 }
 0x126   :  { %v1088_v10 = vrot.slane %v2792_v7, 4  ;;  %v926_v12 = vrot.slane %v2792_v7, 3  ;;  %v666_v13 = vrot.slane %v2792_v7, 1 }
 0x128   :  { %2140 = vmatmul.msk.f32.gmra.mxu0 %vm421_vm0, %v2108_v3  ;;  %v1089_v16 = vsel %vm1086_vm4, %v1087_v8, %v1088_v10  ;;  %v1091_v17 = vsel %vm1086_vm4, %v1088_v10, %v2787_v4  ;;  %v927_v18 = vsel %vm924_vm5, %v925_v11, %v926_v12  ;;  %v929_v20 = vsel %vm924_vm5, %v926_v12, %v2790_v5 }
 0x129   :  { %v1251_v22 = vpack.c.bf16 %v1091_v17, %v1089_v16  ;;  %v2298_v24 = vpack.i.bf16 %v929_v20, %v927_v18  ;;  %v667_v25 = vsel %vm664_vm6, %v665_v14, %v666_v13  ;;  %v669_v26 = vsel %vm664_vm6, %v666_v13, %v2796_v9  ;;  %v2258_v14 = vld [vmem:[#allocation7 + $0x38] sm:$0xff]  ;;  %v2257_v17 = vld [vmem:[#allocation7 + $0x30] sm:$0xff]  ;;  %v265_v20 = vpop.permute.xlu1 %264 }
 0x12a   :  { %v2303_v27 = vpack.i.bf16 %v669_v26, %v667_v25  ;;  %1505 = vmatpush.bf16.msra.mxu1 %v2258_v14  ;;  %v292_v18 = vperm.slane %v2719_v19, 6  ;;  %vm341_vm13 = vcmp.eq.s32.totalorder %v265_v20, %v2722_v21 }
 0x12b   :  { %2235 = vmatmul.msk.bf16.vlgmr.msra.gmra.mxu3 %vm1184_vm7, %v1251_v22  ;;  %2299 = vrot.lane.b32.xlu0 %v2298_v24, %s2626_s20  ;;  %v2256_v22 = vld [vmem:[#allocation7 + $0x28] sm:$0xff]  ;;  %v2114_v24 = vsel %vm341_vm13, 1.0, %v2629_v23  ;;  %vm2032_vm13 = vcmask 1046534  }
 0x12c   :  { %2304 = vrot.lane.b32.xlu2 %v2303_v27, %s2626_s20 }
 0x12d   :  { %v2817_v28 = vpop.f32.mrf.mxu0 }
 0x12e   :  { %v1092_v34 = vrot.slane %v2817_v28, 4  ;;  %v930_v36 = vrot.slane %v2817_v28, 3  ;;  %v670_v39 = vrot.slane %v2817_v28, 1  ;;  %1506 = vmatpush.bf16.msra.mxu1 %v2257_v17 }
 0x130   :  { %2141 = vmatmul.msk.f32.gmra.mxu0 %vm421_vm0, %v2109_v29 }
 0x132   :  { %1507 = vmatpush.bf16.msra.mxu1 %v2256_v22 }
 0x133   :  { %271 = vperm.xlu0 %2295, %v266_v30  }
 0x134   :  { %277 = vperm.xlu2 %2313, %v266_v30  }
 0x135   :  { %v2824_v33 = vpop.f32.mrf.mxu0 }
 0x136   :  { %v1093_v35 = vrot.slane %v2824_v33, 4  ;;  %v931_v37 = vrot.slane %v2824_v33, 3  ;;  %v671_v38 = vrot.slane %v2824_v33, 1 }
 0x138   :  { %2142 = vmatmul.msk.f32.gmra.mxu0 %vm421_vm0, %v2110_v32  ;;  %v1094_v41 = vsel %vm1086_vm4, %v1092_v34, %v1093_v35  ;;  %v1095_v42 = vsel %vm1086_vm4, %v1093_v35, %v2787_v4  ;;  %v932_v43 = vsel %vm924_vm5, %v930_v36, %v931_v37  ;;  %v933_v44 = vsel %vm924_vm5, %v931_v37, %v2790_v5  ;;  %v2255_v32 = vld [vmem:[#allocation7 + $0x20] sm:$0xff] }
 0x139   :  { %v1254_v45 = vpack.c.bf16 %v1095_v42, %v1094_v41  ;;  %v2308_v46 = vpack.i.bf16 %v933_v44, %v932_v43  ;;  %v672_v47 = vsel %vm664_vm6, %v670_v39, %v671_v38  ;;  %v673_v48 = vsel %vm664_vm6, %v671_v38, %v2796_v9  ;;  %1508 = vmatpush.bf16.msra.mxu1 %v2255_v32  ;;  %v2254_v44 = vld [vmem:[#allocation7 + $0x18] sm:$0xff] }
 0x13a   :  { %v2314_v49 = vpack.i.bf16 %v673_v48, %v672_v47  ;;  %v2266_v47 = vld [vmem:[#allocation7 + $0x78] sm:$0xff]  ;;  %v305_v48 = vperm.slane %v2719_v19, 7 }
 0x13b   :  { %2236 = vmatmul.msk.bf16.gmra.mxu3 %vm1184_vm7, %v1254_v45  ;;  %2309 = vrot.lane.b32.xlu1 %v2308_v46, %s2626_s20  ;;  %v2253_v46 = vld [vmem:[#allocation7 + $0x10] sm:$0xff] }
 0x13c   :  { %2315 = vrot.lane.b32.xlu0 %v2314_v49, %s2626_s20  ;;  %2331 = vset.pattern.permute.xlu2 %v2700_v1  ;;  %v2252_v49 = vld [vmem:[#allocation7 + $0x8] sm:$0xff] }
 0x13d   :  { %v2848_v51 = vpop.f32.mrf.mxu0  ;;  %2325 = vset.pattern.permute.xlu0 %v2706_v6  ;;  %1509 = vmatpush.bf16.msra.mxu1 %v2254_v44 }
 0x13e   :  { %v1096_v1 = vrot.slane %v2848_v51, 4  ;;  %v934_v57 = vrot.slane %v2848_v51, 3  ;;  %v674_v60 = vrot.slane %v2848_v51, 1  ;;  %1594 = vmatpush.bf16.msra.mxu2 %v2266_v47 }
 0x140   :  { %2143 = vmatmul.msk.f32.gmra.mxu0 %vm421_vm0, %v2111_v50 }
 0x141   :  { %1510 = vmatpush.bf16.msra.mxu1 %v2253_v46 }
 0x143   :  { %284 = vperm.xlu1 %2319, %v279_v52  }
 0x145   :  { %v2855_v55 = vpop.f32.mrf.mxu0  ;;  %290 = vperm.xlu0 %2325, %v279_v52   ;;  %1511 = vmatpush.bf16.msra.mxu1 %v2252_v49 }
 0x146   :  { %v1097_v56 = vrot.slane %v2855_v55, 4  ;;  %v935_v58 = vrot.slane %v2855_v55, 3  ;;  %v675_v59 = vrot.slane %v2855_v55, 1 }
 0x148   :  { %2144 = vmatmul.msk.f32.gmra.mxu0 %vm421_vm0, %v2112_v54  ;;  %v1098_v62 = vsel %vm1086_vm4, %v1096_v1, %v1097_v56  ;;  %v1099_v0 = vsel %vm1086_vm4, %v1097_v56, %v2787_v4  ;;  %v936_v2 = vsel %vm924_vm5, %v934_v57, %v935_v58  ;;  %v937_v3 = vsel %vm924_vm5, %v935_v58, %v2790_v5  ;;  %v2251_v1 = vld [vmem:[#allocation7] sm:$0xff]  ;;  %v2265_v56 = vld [vmem:[#allocation7 + $0x70] sm:$0xff] }
 0x149   :  { %v1257_v8 = vpack.c.bf16 %v1099_v0, %v1098_v62  ;;  %v2320_v10 = vpack.i.bf16 %v937_v3, %v936_v2  ;;  %v676_v11 = vsel %vm664_vm6, %v674_v60, %v675_v59  ;;  %v677_v12 = vsel %vm664_vm6, %v675_v59, %v2796_v9  ;;  %1512 = vmatpush.bf16.msra.mxu1 %v2251_v1 }
 0x14a   :  { %v2326_v13 = vpack.i.bf16 %v677_v12, %v676_v11  ;;  %1595 = vmatpush.bf16.msra.mxu2 %v2265_v56  ;;  %v2263_v12 = vld [vmem:[#allocation7 + $0x60] sm:$0xff] }
 0x14b   :  { %2237 = vmatmul.msk.bf16.gmra.mxu3 %vm1184_vm7, %v1257_v8  ;;  %2321 = vrot.lane.b32.xlu2 %v2320_v10, %s2626_s20  ;;  %v2264_v10 = vld [vmem:[#allocation7 + $0x68] sm:$0xff] }
 0x14c   :  { %2327 = vrot.lane.b32.xlu1 %v2326_v13, %s2626_s20  ;;  %v2262_v13 = vld [vmem:[#allocation7 + $0x58] sm:$0xff] }
 0x14d   :  { %v2878_v16 = vpop.f32.mrf.mxu0 }
 0x14e   :  { %v1100_v26 = vrot.slane %v2878_v16, 4  ;;  %v938_v29 = vrot.slane %v2878_v16, 3  ;;  %v678_v34 = vrot.slane %v2878_v16, 1  ;;  %1596 = vmatpush.bf16.msra.mxu2 %v2264_v10 }
 0x150   :  { %2145 = vmatmul.msk.f32.gmra.mxu0 %vm421_vm0, %v2113_v15 }
 0x152   :  { %1597 = vmatpush.bf16.msra.mxu2 %v2263_v12 }
 0x153   :  { %297 = vperm.xlu2 %2331, %v292_v18  }
 0x155   :  { %v2884_v25 = vpop.f32.mrf.mxu0 }
 0x156   :  { %v1101_v27 = vrot.slane %v2884_v25, 4  ;;  %v939_v30 = vrot.slane %v2884_v25, 3  ;;  %v679_v31 = vrot.slane %v2884_v25, 1  ;;  %1598 = vmatpush.bf16.msra.mxu2 %v2262_v13 }
 0x158   :  { %2146 = vmatmul.msk.f32.gmra.mxu0 %vm421_vm0, %v2114_v24  ;;  %v1102_v35 = vsel %vm1086_vm4, %v1100_v26, %v1101_v27  ;;  %v1103_v36 = vsel %vm1086_vm4, %v1101_v27, %v2787_v4  ;;  %v940_v37 = vsel %vm924_vm5, %v938_v29, %v939_v30  ;;  %v941_v38 = vsel %vm924_vm5, %v939_v30, %v2790_v5  ;;  %v2261_v26 = vld [vmem:[#allocation7 + $0x50] sm:$0xff] }
 0x159   :  { %v1260_v39 = vpack.c.bf16 %v1103_v36, %v1102_v35  ;;  %v2332_v40 = vpack.i.bf16 %v941_v38, %v940_v37  ;;  %v680_v41 = vsel %vm664_vm6, %v678_v34, %v679_v31  ;;  %v681_v42 = vsel %vm664_vm6, %v679_v31, %v2796_v9  ;;  %v2260_v38 = vld [vmem:[#allocation7 + $0x48] sm:$0xff] }
 0x15a   :  { %v2338_v43 = vpack.i.bf16 %v681_v42, %v680_v41  ;;  %1599 = vmatpush.bf16.msra.mxu2 %v2261_v26 }
 0x15b   :  { %2337 = vset.pattern.permute.xlu2 %v2706_v6  ;;  %2238 = vmatmul.msk.bf16.gmra.mxu3 %vm1184_vm7, %v1260_v39 }
 0x15c   :  { %2333 = vrot.lane.b32.xlu1 %v2332_v40, %s2626_s20  ;;  %2339 = vrot.lane.b32.xlu0 %v2338_v43, %s2626_s20  ;;  %v2259_v40 = vld [vmem:[#allocation7 + $0x40] sm:$0xff] }
 0x15d   :  { %v2906_v45 = vpop.f32.mrf.mxu0 }
 0x15e   :  { %v942_v6 = vrot.slane %v2906_v45, 3  ;;  %v682_v50 = vrot.slane %v2906_v45, 1  ;;  %v1104_v19 = vrot.slane %v2906_v45, 4  ;;  %1600 = vmatpush.bf16.msra.mxu2 %v2260_v38 }
 0x162   :  { %1601 = vmatpush.bf16.msra.mxu2 %v2259_v40 }
 0x163   :  { %303 = vperm.xlu2 %2337, %v292_v18  }
 0x164   :  { %310 = vperm.xlu1 %2319, %v305_v48   ;;  %316 = vperm.xlu0 %2325, %v305_v48  }
 0x165   :  { %v2911_v52 = vpop.f32.mrf.mxu0 }
 0x166   :  { %v943_v53 = vrot.slane %v2911_v52, 3  ;;  %v683_v54 = vrot.slane %v2911_v52, 1  ;;  %v1105_v57 = vrot.slane %v2911_v52, 4 }
 0x168   :  { %v944_v58 = vsel %vm924_vm5, %v942_v6, %v943_v53  ;;  %v945_v59 = vsel %vm924_vm5, %v943_v53, %v2790_v5  ;;  %v684_v60 = vsel %vm664_vm6, %v682_v50, %v683_v54  ;;  %v685_v61 = vsel %vm664_vm6, %v683_v54, %v2796_v9 }
 0x169   :  { %v2343_v62 = vpack.i.bf16 %v945_v59, %v944_v58  ;;  %v2348_v0 = vpack.i.bf16 %v685_v61, %v684_v60  ;;  %v1106_v2 = vsel %vm1086_vm4, %v1104_v19, %v1105_v57  ;;  %v1107_v3 = vsel %vm1086_vm4, %v1105_v57, %v2787_v4 }
 0x16a   :  { %v1263_v8 = vpack.c.bf16 %v1107_v3, %v1106_v2 }
 0x16b   :  { %2344 = vrot.lane.b32.xlu2 %v2343_v62, %s2626_s20 }
 0x16c   :  { %2349 = vrot.lane.b32.xlu1 %v2348_v0, %s2626_s20  ;;  %2239 = vmatmul.msk.bf16.gmra.mxu3 %vm1184_vm7, %v1263_v8 }
 0x16d   :  { %v2928_v11 = vpop.f32.mrf.mxu0 }
 0x16e   :  { %v946_v14 = vrot.slane %v2928_v11, 3  ;;  %v686_v15 = vrot.slane %v2928_v11, 1  ;;  %v1108_v17 = vrot.slane %v2928_v11, 4 }
 0x175   :  { %v2934_v18 = vpop.f32.mrf.mxu0 }
 0x176   :  { %v1109_v20 = vrot.slane %v2934_v18, 4  ;;  %v947_v22 = vrot.slane %v2934_v18, 3  ;;  %v687_v24 = vrot.slane %v2934_v18, 1 }
 0x178   :  { %v948_v27 = vsel %vm924_vm5, %v946_v14, %v947_v22  ;;  %v949_v29 = vsel %vm924_vm5, %v947_v22, %v2790_v5  ;;  %v688_v30 = vsel %vm664_vm6, %v686_v15, %v687_v24  ;;  %v689_v31 = vsel %vm664_vm6, %v687_v24, %v2796_v9 }
 0x179   :  { %v2353_v32 = vpack.i.bf16 %v949_v29, %v948_v27  ;;  %v2358_v34 = vpack.i.bf16 %v689_v31, %v688_v30  ;;  %v1110_v35 = vsel %vm1086_vm4, %v1108_v17, %v1109_v20  ;;  %v1111_v36 = vsel %vm1086_vm4, %v1109_v20, %v2787_v4 }
 0x17a   :  { %v1266_v37 = vpack.c.bf16 %v1111_v36, %v1110_v35 }
 0x17b   :  { %2354 = vrot.lane.b32.xlu2 %v2353_v32, %s2626_s20  ;;  %2359 = vrot.lane.b32.xlu0 %v2358_v34, %s2626_s20  ;;  %v828_v32 = vrot.slane %v2792_v7, 2  ;;  %v3000_v34 = vrot.slane %v2629_v23, 2 }
 0x17c   :  { %2240 = vmatmul.msk.bf16.gmra.mxu3 %vm1184_vm7, %v1266_v37  ;;  %v827_v37 = vrot.slane %v2780_v63, 2 }
 0x17d   :  { %v2950_v39 = vpop.f32.mrf.mxu0 }
 0x17e   :  { %v950_v41 = vrot.slane %v2950_v39, 3  ;;  %v690_v42 = vrot.slane %v2950_v39, 1  ;;  %v1112_v44 = vrot.slane %v2950_v39, 4 }
 0x185   :  { %v2955_v43 = vpop.f32.mrf.mxu0 }
 0x186   :  { %v2305_v46 = vpop.permute.xlu2 %2304  ;;  %v1113_v47 = vrot.slane %v2955_v43, 4  ;;  %v951_v48 = vrot.slane %v2955_v43, 3  ;;  %v691_v49 = vrot.slane %v2955_v43, 1 }
 0x187   :  { %v2307_v6 = vunpack.i.h.bf16 %v2305_v46  ;;  %v2306_v50 = vunpack.i.l.bf16 %v2305_v46 }
 0x188   :  { %v952_v53 = vsel %vm924_vm5, %v950_v41, %v951_v48  ;;  %v953_v54 = vsel %vm924_vm5, %v951_v48, %v2790_v5  ;;  %v692_v1 = vsel %vm664_vm6, %v690_v42, %v691_v49  ;;  %v693_v56 = vsel %vm664_vm6, %v691_v49, %v2796_v9 }
 0x189   :  { %v1185_v19 = vsel %vm1184_vm7, %v2780_v63, %v2306_v50  ;;  %v1186_v57 = vsel %vm1184_vm7, %v2792_v7, %v2307_v6  ;;  %v2363_v58 = vpack.i.bf16 %v953_v54, %v952_v53  ;;  %v2368_v59 = vpack.i.bf16 %v693_v56, %v692_v1 }
 0x18a   :  { %v1249_v60 = vpack.c.bf16 %v1186_v57, %v1185_v19  ;;  %v1114_v61 = vsel %vm1086_vm4, %v1112_v44, %v1113_v47  ;;  %v1115_v62 = vsel %vm1086_vm4, %v1113_v47, %v2787_v4  ;;  %v829_v41 = vsel %vm826_vm14, %v827_v37, %v828_v32 }
 0x18b   :  { %2364 = vrot.lane.b32.xlu1 %v2363_v58, %s2626_s20  ;;  %2369 = vrot.lane.b32.xlu2 %v2368_v59, %s2626_s20  ;;  %v1269_v0 = vpack.c.bf16 %v1115_v62, %v1114_v61  ;;  %v831_v42 = vsel %vm826_vm14, %v828_v32, %v3000_v34 }
 0x18c   :  { %1513 = vmatmul.bf16.vlgmr.msra.gmra.mxu1 %v1249_v60 }
 0x18d   :  { %v2976_v2 = vpop.f32.mrf.mxu0  ;;  %2241 = vmatmul.msk.bf16.gmra.mxu3 %vm1184_vm7, %v1269_v0  ;;  %v833_v0 = vrot.slane %v2824_v33, 2 }
 0x18e   :  { %v954_v3 = vrot.slane %v2976_v2, 3  ;;  %v694_v8 = vrot.slane %v2976_v2, 1  ;;  %v1116_v10 = vrot.slane %v2976_v2, 4  ;;  %v278_v59 = vpop.permute.xlu2 %277 }
 0x18f   :  { %vm343_vm1 = vcmp.eq.s32.totalorder %v278_v59, %v2722_v21 }
 0x195   :  { %v2982_v12 = vpop.f32.mrf.mxu0 }
 0x196   :  { %v1117_v13 = vrot.slane %v2982_v12, 4  ;;  %v955_v14 = vrot.slane %v2982_v12, 3  ;;  %v695_v15 = vrot.slane %v2982_v12, 1 }
 0x198   :  { %v956_v17 = vsel %vm924_vm5, %v954_v3, %v955_v14  ;;  %v957_v20 = vsel %vm924_vm5, %v955_v14, %v2790_v5  ;;  %v696_v22 = vsel %vm664_vm6, %v694_v8, %v695_v15  ;;  %v697_v24 = vsel %vm664_vm6, %v695_v15, %v2796_v9 }
 0x199   :  { %v2373_v26 = vpack.i.bf16 %v957_v20, %v956_v17  ;;  %v2378_v27 = vpack.i.bf16 %v697_v24, %v696_v22  ;;  %v1118_v29 = vsel %vm1086_vm4, %v1116_v10, %v1117_v13  ;;  %v1119_v30 = vsel %vm1086_vm4, %v1117_v13, %v2787_v4 }
 0x19a   :  { %v1272_v31 = vpack.c.bf16 %v1119_v30, %v1118_v29  ;;  %v832_v14 = vrot.slane %v2817_v28, 2  ;;  %v2116_v15 = vsel %vm343_vm1, 1.0, %v2629_v23  ;;  %v835_v29 = vsel %vm826_vm14, %v833_v0, %v3000_v34 }
 0x19b   :  { %2374 = vrot.lane.b32.xlu0 %v2373_v26, %s2626_s20  ;;  %2379 = vrot.lane.b32.xlu1 %v2378_v27, %s2626_s20 }
 0x19c   :  { %v834_v27 = vsel %vm826_vm14, %v832_v14, %v833_v0 }
 0x19d   :  { %v3002_v35 = vpop.f32.mrf.mxu0  ;;  %v2300_v36 = vpop.permute.xlu0 %2299  ;;  %2242 = vmatmul.msk.bf16.gmra.mxu3 %vm1184_vm7, %v1272_v31 }
 0x19e   :  { %v2302_v38 = vunpack.i.h.bf16 %v2300_v36  ;;  %v2301_v40 = vunpack.i.l.bf16 %v2300_v36  ;;  %v958_v48 = vrot.slane %v3002_v35, 3  ;;  %v698_v63 = vrot.slane %v3002_v35, 1 }
 0x19f   :  { %v1120_v49 = vrot.slane %v3002_v35, 4 }
 0x1a0   :  { %v1217_v7 = vsel %vm1184_vm7, %v829_v41, %v2301_v40  ;;  %v1218_v44 = vsel %vm1184_vm7, %v831_v42, %v2302_v38 }
 0x1a1   :  { %v1250_v46 = vpack.c.bf16 %v1218_v44, %v1217_v7 }
 0x1a3   :  { %1602 = vmatmul.bf16.vlgmr.msra.gmra.mxu2 %v1250_v46 }
 0x1a5   :  { %v3011_v47 = vpop.f32.mrf.mxu0  ;;  %v272_v50 = vpop.permute.xlu0 %271 }
 0x1a6   :  { %v1121_v6 = vrot.slane %v3011_v47, 4  ;;  %vm342_vm15 = vcmp.eq.s32.totalorder %v272_v50, %v2722_v21  ;;  %v959_v53 = vrot.slane %v3011_v47, 3  ;;  %v699_v54 = vrot.slane %v3011_v47, 1  ;;  %v2322_v44 = vpop.permute.xlu2 %2321 }
 0x1a7   :  { %v2115_v1 = vsel %vm342_vm15, 1.0, %v2629_v23  ;;  %vm2034_vm15 = vcmask 1047559  }
 0x1a8   :  { %2147 = vmatmul.msk.f32.gmra.mxu0 %vm421_vm0, %v2115_v1  ;;  %v960_v56 = vsel %vm924_vm5, %v958_v48, %v959_v53  ;;  %v961_v19 = vsel %vm924_vm5, %v959_v53, %v2790_v5  ;;  %v700_v57 = vsel %vm664_vm6, %v698_v63, %v699_v54  ;;  %v701_v58 = vsel %vm664_vm6, %v699_v54, %v2796_v9 }
 0x1a9   :  { %v2383_v60 = vpack.i.bf16 %v961_v19, %v960_v56  ;;  %v2388_v61 = vpack.i.bf16 %v701_v58, %v700_v57  ;;  %v1122_v62 = vsel %vm1086_vm4, %v1120_v49, %v1121_v6  ;;  %v1123_v3 = vsel %vm1086_vm4, %v1121_v6, %v2787_v4 }
 0x1aa   :  { %v1275_v8 = vpack.c.bf16 %v1123_v3, %v1122_v62  ;;  %v837_v53 = vrot.slane %v2855_v55, 2  ;;  %v2324_v54 = vunpack.i.h.bf16 %v2322_v44  ;;  %v2323_v57 = vunpack.i.l.bf16 %v2322_v44 }
 0x1ab   :  { %2384 = vrot.lane.b32.xlu2 %v2383_v60, %s2626_s20  ;;  %2389 = vrot.lane.b32.xlu0 %v2388_v61, %s2626_s20  ;;  %v836_v61 = vrot.slane %v2848_v51, 2 }
 0x1ad   :  { %v2310_v10 = vpop.permute.xlu1 %2309  ;;  %v3035_v13 = vpop.f32.mrf.mxu0  ;;  %2243 = vmatmul.msk.bf16.gmra.mxu3 %vm1184_vm7, %v1275_v8  ;;  %v838_v3 = vsel %vm826_vm14, %v836_v61, %v837_v53  ;;  %v839_v8 = vsel %vm826_vm14, %v837_v53, %v3000_v34 }
 0x1ae   :  { %v2312_v17 = vunpack.i.h.bf16 %v2310_v10  ;;  %v2311_v20 = vunpack.i.l.bf16 %v2310_v10  ;;  %v2316_v22 = vpop.permute.xlu0 %2315  ;;  %v962_v40 = vrot.slane %v3035_v13, 3  ;;  %v702_v7 = vrot.slane %v3035_v13, 1 }
 0x1af   :  { %v2318_v24 = vunpack.i.h.bf16 %v2316_v22  ;;  %v2317_v26 = vunpack.i.l.bf16 %v2316_v22  ;;  %v1124_v46 = vrot.slane %v3035_v13, 4 }
 0x1b0   :  { %v1219_v30 = vsel %vm1184_vm7, %v834_v27, %v2311_v20  ;;  %v1220_v31 = vsel %vm1184_vm7, %v835_v29, %v2312_v17  ;;  %2148 = vmatmul.msk.f32.gmra.mxu0 %vm421_vm0, %v2116_v15  ;;  %v1221_v15 = vsel %vm1184_vm7, %v838_v3, %v2323_v57  ;;  %v1222_v17 = vsel %vm1184_vm7, %v839_v8, %v2324_v54 }
 0x1b1   :  { %v1187_v32 = vsel %vm1184_vm7, %v2817_v28, %v2317_v26  ;;  %v1188_v36 = vsel %vm1184_vm7, %v2824_v33, %v2318_v24  ;;  %v1253_v37 = vpack.c.bf16 %v1220_v31, %v1219_v30  ;;  %v298_v24 = vpop.permute.xlu2 %297  ;;  %v1256_v29 = vpack.c.bf16 %v1222_v17, %v1221_v15 }
 0x1b2   :  { %v1252_v38 = vpack.c.bf16 %v1188_v36, %v1187_v32  ;;  %vm346_vm8 = vcmp.eq.s32.totalorder %v298_v24, %v2722_v21 }
 0x1b3   :  { %1607 = vmatmul.bf16.gmra.mxu2 %v1253_v37 }
 0x1b4   :  { %1518 = vmatmul.bf16.gmra.mxu1 %v1252_v38 }
 0x1b5   :  { %v285_v41 = vpop.permute.xlu1 %284  ;;  %v3051_v42 = vpop.f32.mrf.mxu0 }
 0x1b6   :  { %vm344_vm2 = vcmp.eq.s32.totalorder %v285_v41, %v2722_v21  ;;  %v1125_v28 = vrot.slane %v3051_v42, 4  ;;  %v963_v33 = vrot.slane %v3051_v42, 3  ;;  %v703_v63 = vrot.slane %v3051_v42, 1 }
 0x1b7   :  { %v2117_v48 = vsel %vm344_vm2, 1.0, %v2629_v23  ;;  %v291_v50 = vpop.permute.xlu0 %290 }
 0x1b8   :  { %v964_v49 = vsel %vm924_vm5, %v962_v40, %v963_v33  ;;  %v965_v6 = vsel %vm924_vm5, %v963_v33, %v2790_v5  ;;  %2149 = vmatmul.msk.f32.gmra.mxu0 %vm421_vm0, %v2117_v48  ;;  %v704_v56 = vsel %vm664_vm6, %v702_v7, %v703_v63  ;;  %v705_v19 = vsel %vm664_vm6, %v703_v63, %v2796_v9 }
 0x1b9   :  { %v2393_v1 = vpack.i.bf16 %v965_v6, %v964_v49  ;;  %v2398_v58 = vpack.i.bf16 %v705_v19, %v704_v56  ;;  %v1126_v59 = vsel %vm1086_vm4, %v1124_v46, %v1125_v28  ;;  %v1127_v60 = vsel %vm1086_vm4, %v1125_v28, %v2787_v4 }
 0x1ba   :  { %vm345_vm3 = vcmp.eq.s32.totalorder %v291_v50, %v2722_v21  ;;  %v1278_v62 = vpack.c.bf16 %v1127_v60, %v1126_v59  ;;  %v2119_v40 = vsel %vm346_vm8, 1.0, %v2629_v23  ;;  %v841_v50 = vrot.slane %v2884_v25, 2 }
 0x1bb   :  { %2394 = vrot.lane.b32.xlu1 %v2393_v1, %s2626_s20  ;;  %2399 = vrot.lane.b32.xlu2 %v2398_v58, %s2626_s20  ;;  %v2118_v14 = vsel %vm345_vm3, 1.0, %v2629_v23  ;;  %v840_v19 = vrot.slane %v2878_v16, 2 }
 0x1bd   :  { %v3075_v0 = vpop.f32.mrf.mxu0  ;;  %2244 = vmatmul.msk.bf16.gmra.mxu3 %vm1184_vm7, %v1278_v62  ;;  %v304_v48 = vpop.permute.xlu2 %303  ;;  %v842_v61 = vsel %vm826_vm14, %v840_v19, %v841_v50  ;;  %v843_v62 = vsel %vm826_vm14, %v841_v50, %v3000_v34 }
 0x1be   :  { %v2328_v10 = vpop.permute.xlu1 %2327  ;;  %v1128_v31 = vrot.slane %v3075_v0, 4  ;;  %v966_v36 = vrot.slane %v3075_v0, 3  ;;  %v706_v37 = vrot.slane %v3075_v0, 1  ;;  %vm347_vm9 = vcmp.eq.s32.totalorder %v304_v48, %v2722_v21 }
 0x1bf   :  { %v2330_v20 = vunpack.i.h.bf16 %v2328_v10  ;;  %v2329_v22 = vunpack.i.l.bf16 %v2328_v10  ;;  %v2120_v54 = vsel %vm347_vm9, 1.0, %v2629_v23 }
 0x1c0   :  { %2150 = vmatmul.msk.f32.gmra.mxu0 %vm421_vm0, %v2118_v14 }
 0x1c1   :  { %v1189_v26 = vsel %vm1184_vm7, %v2848_v51, %v2329_v22  ;;  %v1190_v27 = vsel %vm1184_vm7, %v2855_v55, %v2330_v20 }
 0x1c2   :  { %v1255_v30 = vpack.c.bf16 %v1190_v27, %v1189_v26 }
 0x1c3   :  { %1612 = vmatmul.bf16.gmra.mxu2 %v1256_v29 }
 0x1c4   :  { %1523 = vmatmul.bf16.gmra.mxu1 %v1255_v30 }
 0x1c5   :  { %v3091_v32 = vpop.f32.mrf.mxu0  ;;  %v2345_v30 = vpop.permute.xlu2 %2344 }
 0x1c6   :  { %v1129_v38 = vrot.slane %v3091_v32, 4  ;;  %v967_v51 = vrot.slane %v3091_v32, 3  ;;  %v707_v55 = vrot.slane %v3091_v32, 1 }
 0x1c8   :  { %v1130_v41 = vsel %vm1086_vm4, %v1128_v31, %v1129_v38  ;;  %v1131_v7 = vsel %vm1086_vm4, %v1129_v38, %v2787_v4  ;;  %2151 = vmatmul.msk.f32.gmra.mxu0 %vm421_vm0, %v2119_v40  ;;  %v968_v44 = vsel %vm924_vm5, %v966_v36, %v967_v51  ;;  %v969_v46 = vsel %vm924_vm5, %v967_v51, %v2790_v5 }
 0x1c9   :  { %v708_v28 = vsel %vm664_vm6, %v706_v37, %v707_v55  ;;  %v709_v33 = vsel %vm664_vm6, %v707_v55, %v2796_v9  ;;  %v2403_v63 = vpack.i.bf16 %v969_v46, %v968_v44  ;;  %v1281_v6 = vpack.c.bf16 %v1131_v7, %v1130_v41 }
 0x1ca   :  { %v2408_v49 = vpack.i.bf16 %v709_v33, %v708_v28  ;;  %v844_v36 = vrot.slane %v2906_v45, 2  ;;  %v845_v44 = vrot.slane %v2911_v52, 2  ;;  %v2347_v28 = vunpack.i.h.bf16 %v2345_v30 }
 0x1cb   :  { %2404 = vrot.lane.b32.xlu0 %v2403_v63, %s2626_s20  ;;  %v2346_v33 = vunpack.i.l.bf16 %v2345_v30  ;;  %v853_v30 = vrot.slane %v2955_v43, 2 }
 0x1cc   :  { %2409 = vrot.lane.b32.xlu1 %v2408_v49, %s2626_s20  ;;  %v847_v50 = vsel %vm826_vm14, %v845_v44, %v3000_v34 }
 0x1cd   :  { %v3113_v53 = vpop.f32.mrf.mxu0  ;;  %2245 = vmatmul.msk.bf16.gmra.mxu3 %vm1184_vm7, %v1281_v6  ;;  %v846_v6 = vsel %vm826_vm14, %v844_v36, %v845_v44  ;;  %v1226_v19 = vsel %vm1184_vm7, %v847_v50, %v2347_v28  ;;  %v1692_v44 = vpop.f32.mrf.mxu3 }
 0x1ce   :  { %v2334_v1 = vpop.permute.xlu1 %2333  ;;  %v2340_v56 = vpop.permute.xlu0 %2339  ;;  %v970_v22 = vrot.slane %v3113_v53, 3  ;;  %v710_v24 = vrot.slane %v3113_v53, 1  ;;  %v1132_v26 = vrot.slane %v3113_v53, 4 }
 0x1cf   :  { %v2336_v57 = vunpack.i.h.bf16 %v2334_v1  ;;  %v2335_v58 = vunpack.i.l.bf16 %v2334_v1  ;;  %v2342_v59 = vunpack.i.h.bf16 %v2340_v56  ;;  %v2341_v60 = vunpack.i.l.bf16 %v2340_v56 }
 0x1d0   :  { %2152 = vmatmul.msk.f32.gmra.mxu0 %vm421_vm0, %v2120_v54  ;;  %v1225_v56 = vsel %vm1184_vm7, %v846_v6, %v2346_v33  ;;  %v856_v33 = vrot.slane %v2976_v2, 2 }
 0x1d1   :  { %v1191_v3 = vsel %vm1184_vm7, %v2878_v16, %v2341_v60  ;;  %v1192_v8 = vsel %vm1184_vm7, %v2884_v25, %v2342_v59  ;;  %v1223_v10 = vsel %vm1184_vm7, %v842_v61, %v2335_v58  ;;  %v1224_v14 = vsel %vm1184_vm7, %v843_v62, %v2336_v57 }
 0x1d2   :  { %v1258_v15 = vpack.c.bf16 %v1192_v8, %v1191_v3  ;;  %v1259_v17 = vpack.c.bf16 %v1224_v14, %v1223_v10  ;;  %v1262_v60 = vpack.c.bf16 %v1226_v19, %v1225_v56  ;;  %v848_v62 = vrot.slane %v2928_v11, 2 }
 0x1d3   :  { %v849_v3 = vrot.slane %v2934_v18, 2 }
 0x1d4   :  { %1528 = vmatmul.bf16.gmra.mxu1 %v1258_v15  ;;  %1617 = vmatmul.bf16.gmra.mxu2 %v1259_v17 }
 0x1d5   :  { %v3128_v20 = vpop.f32.mrf.mxu0  ;;  %v2355_v61 = vpop.permute.xlu2 %2354  ;;  %v850_v17 = vsel %vm826_vm14, %v848_v62, %v849_v3 }
 0x1d6   :  { %v311_v16 = vpop.permute.xlu1 %310  ;;  %v1133_v27 = vrot.slane %v3128_v20, 4  ;;  %v971_v25 = vrot.slane %v3128_v20, 3  ;;  %v711_v29 = vrot.slane %v3128_v20, 1  ;;  %v317_v40 = vpop.permute.xlu0 %316  ;;  %v2357_v8 = vunpack.i.h.bf16 %v2355_v61 }
 0x1d7   :  { %vm348_vm10 = vcmp.eq.s32.totalorder %v311_v16, %v2722_v21  ;;  %vm349_vm11 = vcmp.eq.s32.totalorder %v317_v40, %v2722_v21  ;;  %v2356_v10 = vunpack.i.l.bf16 %v2355_v61  ;;  %v855_v40 = vsel %vm826_vm14, %v853_v30, %v3000_v34 }
 0x1d8   :  { %v2121_v31 = vsel %vm348_vm10, 1.0, %v2629_v23  ;;  %v972_v37 = vsel %vm924_vm5, %v970_v22, %v971_v25  ;;  %v973_v38 = vsel %vm924_vm5, %v971_v25, %v2790_v5  ;;  %v712_v51 = vsel %vm664_vm6, %v710_v24, %v711_v29 }
 0x1d9   :  { %2153 = vmatmul.msk.f32.gmra.mxu0 %vm421_vm0, %v2121_v31  ;;  %v713_v55 = vsel %vm664_vm6, %v711_v29, %v2796_v9  ;;  %v2413_v41 = vpack.i.bf16 %v973_v38, %v972_v37  ;;  %v1134_v46 = vsel %vm1086_vm4, %v1132_v26, %v1133_v27  ;;  %v1135_v48 = vsel %vm1086_vm4, %v1133_v27, %v2787_v4 }
 0x1da   :  { %v2418_v7 = vpack.i.bf16 %v713_v55, %v712_v51  ;;  %v1284_v63 = vpack.c.bf16 %v1135_v48, %v1134_v46  ;;  %v2122_v57 = vsel %vm349_vm11, 1.0, %v2629_v23  ;;  %v852_v29 = vrot.slane %v2950_v39, 2  ;;  %v3189_v48 = vpop.f32.mrf.mxu3 }
 0x1db   :  { %2414 = vrot.lane.b32.xlu2 %v2413_v41, %s2626_s20 }
 0x1dc   :  { %2419 = vrot.lane.b32.xlu0 %v2418_v7, %s2626_s20  ;;  %v854_v55 = vsel %vm826_vm14, %v852_v29, %v853_v30 }
 0x1dd   :  { %2246 = vmatmul.msk.bf16.gmra.mxu3 %vm1184_vm7, %v1284_v63 }
 0x1de   :  { %v2350_v49 = vpop.permute.xlu1 %2349 }
 0x1df   :  { %v2352_v54 = vunpack.i.h.bf16 %v2350_v49  ;;  %v2351_v1 = vunpack.i.l.bf16 %v2350_v49 }
 0x1e1   :  { %2154 = vmatmul.msk.f32.gmra.mxu0 %vm421_vm0, %v2122_v57  ;;  %v1193_v21 = vsel %vm1184_vm7, %v2906_v45, %v2351_v1  ;;  %v1194_v58 = vsel %vm1184_vm7, %v2911_v52, %v2352_v54  ;;  %v851_v45 = vsel %vm826_vm14, %v849_v3, %v3000_v34  ;;  %v1227_v52 = vsel %vm1184_vm7, %v850_v17, %v2356_v10 }
 0x1e2   :  { %v1261_v59 = vpack.c.bf16 %v1194_v58, %v1193_v21  ;;  %v1228_v22 = vsel %vm1184_vm7, %v851_v45, %v2357_v8  ;;  %v3200_v61 = vpop.f32.mrf.mxu3  ;;  %v860_v3 = vrot.slane %v3002_v35, 2  ;;  %v861_v8 = vrot.slane %v3011_v47, 2 }
 0x1e3   :  { %v1265_v27 = vpack.c.bf16 %v1228_v22, %v1227_v52  ;;  %vm2022_vm0 = vcmask 1041409  }
 0x1e4   :  { %1533 = vmatmul.bf16.gmra.mxu1 %v1261_v59  ;;  %1622 = vmatmul.bf16.gmra.mxu2 %v1262_v60 }
 0x1e5   :  { %v2370_v25 = vpop.permute.xlu2 %2369 }
 0x1e6   :  { %v2372_v31 = vunpack.i.h.bf16 %v2370_v25  ;;  %v2371_v36 = vunpack.i.l.bf16 %v2370_v25 }
 0x1ed   :  { %v2360_v23 = vpop.permute.xlu0 %2359 }
 0x1ee   :  { %v2362_v14 = vunpack.i.h.bf16 %v2360_v23  ;;  %v2361_v15 = vunpack.i.l.bf16 %v2360_v23 }
 0x1f0   :  { %v1195_v24 = vsel %vm1184_vm7, %v2928_v11, %v2361_v15  ;;  %v1196_v26 = vsel %vm1184_vm7, %v2934_v18, %v2362_v14  ;;  %v1197_v11 = vsel %vm1184_vm7, %v2950_v39, %v2371_v36  ;;  %v1198_v18 = vsel %vm1184_vm7, %v2955_v43, %v2372_v31  ;;  %v3207_v15 = vpop.f32.mrf.mxu3 }
 0x1f1   :  { %v1264_v16 = vpack.c.bf16 %v1196_v26, %v1195_v24  ;;  %v1267_v28 = vpack.c.bf16 %v1198_v18, %v1197_v11  ;;  %v857_v39 = vrot.slane %v2982_v12, 2  ;;  %v863_v14 = vsel %vm826_vm14, %v861_v8, %v3000_v34 }
 0x1f2   :  { %v865_v11 = vrot.slane %v3051_v42, 2 }
 0x1f3   :  { %v858_v1 = vsel %vm826_vm14, %v856_v33, %v857_v39  ;;  %v859_v56 = vsel %vm826_vm14, %v857_v39, %v3000_v34 }
 0x1f4   :  { %1538 = vmatmul.bf16.gmra.mxu1 %v1264_v16  ;;  %1627 = vmatmul.bf16.gmra.mxu2 %v1265_v27  ;;  %v867_v33 = vsel %vm826_vm14, %v865_v11, %v3000_v34 }
 0x1f8   :  { %v3219_v18 = vpop.f32.mrf.mxu3 }
 0x1fd   :  { %v2365_v37 = vpop.permute.xlu1 %2364 }
 0x1fe   :  { %v2367_v38 = vunpack.i.h.bf16 %v2365_v37  ;;  %v2366_v51 = vunpack.i.l.bf16 %v2365_v37 }
 0x200   :  { %v1229_v41 = vsel %vm1184_vm7, %v854_v55, %v2366_v51  ;;  %v1230_v7 = vsel %vm1184_vm7, %v855_v40, %v2367_v38  ;;  %v864_v51 = vrot.slane %v3035_v13, 2 }
 0x201   :  { %v1268_v46 = vpack.c.bf16 %v1230_v7, %v1229_v41  ;;  %v3228_v41 = vld [vmem:[%s3497_s3] ss:$0 sm:$0xff] }
 0x204   :  { %1543 = vmatmul.bf16.gmra.mxu1 %v1267_v28  ;;  %1632 = vmatmul.bf16.gmra.mxu2 %v1268_v46  ;;  %v866_v28 = vsel %vm826_vm14, %v864_v51, %v865_v11 }
 0x205   :  { %v2385_v62 = vpop.permute.xlu2 %2384 }
 0x206   :  { %v2387_v10 = vunpack.i.h.bf16 %v2385_v62 }
 0x208   :  { %v1234_v24 = vsel %vm1184_vm7, %v863_v14, %v2387_v10 }
 0x209   :  { %v1514_v17 = vpop.f32.mrf.mxu1 }
 0x20d   :  { %v2380_v43 = vpop.permute.xlu1 %2379  ;;  %v2375_v63 = vpop.permute.xlu0 %2374 }
 0x20e   :  { %v2382_v49 = vunpack.i.h.bf16 %v2380_v43  ;;  %v2381_v6 = vunpack.i.l.bf16 %v2380_v43  ;;  %v2377_v50 = vunpack.i.h.bf16 %v2375_v63  ;;  %v2376_v54 = vunpack.i.l.bf16 %v2375_v63 }
 0x210   :  { %v1199_v19 = vsel %vm1184_vm7, %v2976_v2, %v2381_v6  ;;  %v1200_v57 = vsel %vm1184_vm7, %v2982_v12, %v2382_v49  ;;  %v1231_v21 = vsel %vm1184_vm7, %v858_v1, %v2376_v54  ;;  %v1232_v58 = vsel %vm1184_vm7, %v859_v56, %v2377_v50 }
 0x211   :  { %v1270_v59 = vpack.c.bf16 %v1200_v57, %v1199_v19  ;;  %v1271_v60 = vpack.c.bf16 %v1232_v58, %v1231_v21  ;;  %v2386_v2 = vunpack.i.l.bf16 %v2385_v62  ;;  %v862_v12 = vsel %vm826_vm14, %v860_v3, %v861_v8 }
 0x213   :  { %v1233_v22 = vsel %vm1184_vm7, %v862_v12, %v2386_v2 }
 0x214   :  { %1548 = vmatmul.bf16.gmra.mxu1 %v1270_v59  ;;  %1637 = vmatmul.bf16.gmra.mxu2 %v1271_v60  ;;  %v1274_v25 = vpack.c.bf16 %v1234_v24, %v1233_v22 }
 0x215   :  { %v2400_v29 = vpop.permute.xlu2 %2399 }
 0x216   :  { %v2402_v30 = vunpack.i.h.bf16 %v2400_v29  ;;  %v2401_v31 = vunpack.i.l.bf16 %v2400_v29 }
 0x218   :  { %v1204_v55 = vsel %vm1184_vm7, %v3051_v42, %v2402_v30 }
 0x21d   :  { %v2390_v23 = vpop.permute.xlu0 %2389 }
 0x21e   :  { %v2392_v45 = vunpack.i.h.bf16 %v2390_v23  ;;  %v2391_v52 = vunpack.i.l.bf16 %v2390_v23  ;;  %v3252_v23 = vpop.f32.mrf.mxu3 }
 0x220   :  { %v1201_v26 = vsel %vm1184_vm7, %v3002_v35, %v2391_v52  ;;  %v1202_v16 = vsel %vm1184_vm7, %v3011_v47, %v2392_v45  ;;  %v1516_v35 = vpop.f32.mrf.mxu1  ;;  %v1203_v47 = vsel %vm1184_vm7, %v3035_v13, %v2401_v31  ;;  %v3257_v45 = vld [vmem:[#allocation8] sm:$0xff]  ;;  %v3259_v52 = vld [vmem:[#allocation8 + $0x8] sm:$0xff] }
 0x221   :  { %v1273_v27 = vpack.c.bf16 %v1202_v16, %v1201_v26  ;;  %v1276_v46 = vpack.c.bf16 %v1204_v55, %v1203_v47 }
 0x224   :  { %1553 = vmatmul.bf16.gmra.mxu1 %v1273_v27  ;;  %1642 = vmatmul.bf16.gmra.mxu2 %v1274_v25 }
 0x225   :  { %v3215_v36 = vpop.f32.mrf.mxu0 }
 0x226   :  { %v1603_v37 = vpop.f32.mrf.mxu2  ;;  %v1136_v39 = vrot.slane %v3215_v36, 4  ;;  %v714_v54 = vrot.slane %v3215_v36, 1 }
 0x227   :  { %v1604_v38 = vadd.f32 %v1603_v37, %v1514_v17  ;;  %v868_v37 = vrot.slane %v3075_v0, 2 }
 0x229   :  { %v1693_v40 = vadd.f32 %v1692_v44, %v1604_v38  ;;  %v974_v44 = vrot.slane %v3215_v36, 3  ;;  %v869_v38 = vrot.slane %v3091_v32, 2 }
 0x22b   :  { %v1776_v49 = vadd.f32 %v3228_v41, %v1693_v40 }
 0x22d   :  { %v2395_v7 = vpop.permute.xlu1 %2394  ;;  %v3234_v63 = vpop.f32.mrf.mxu0  ;;  %v1808_v12 = vmax.f32 %v1776_v49, 0.0 }
 0x22e   :  { %v2397_v43 = vunpack.i.h.bf16 %v2395_v7  ;;  %v2396_v13 = vunpack.i.l.bf16 %v2395_v7  ;;  %v1605_v42 = vpop.f32.mrf.mxu2  ;;  %v1137_v6 = vrot.slane %v3234_v63, 4  ;;  %v975_v1 = vrot.slane %v3234_v63, 3 }
 0x22f   :  { %v1606_v50 = vadd.f32 %v1605_v42, %v1516_v35  ;;  %v715_v56 = vrot.slane %v3234_v63, 1  ;;  %v1842_v16 = vmul.f32 %v3257_v45, %v1808_v12  ;;  %v3271_v35 = vpop.f32.mrf.mxu3  ;;  %v870_v7 = vsel %vm826_vm14, %v868_v37, %v869_v38 }
 0x230   :  { %v1235_v19 = vsel %vm1184_vm7, %v866_v28, %v2396_v13  ;;  %v1236_v57 = vsel %vm1184_vm7, %v867_v33, %v2397_v43  ;;  %v1138_v59 = vsel %vm1086_vm4, %v1136_v39, %v1137_v6  ;;  %v1139_v60 = vsel %vm1086_vm4, %v1137_v6, %v2787_v4 }
 0x231   :  { %v1695_v21 = vadd.f32 %v3189_v48, %v1606_v50  ;;  %v1519_v58 = vpop.f32.mrf.mxu1  ;;  %v1277_v62 = vpack.c.bf16 %v1236_v57, %v1235_v19  ;;  %v1287_v3 = vpack.c.bf16 %v1139_v60, %v1138_v59  ;;  %v976_v8 = vsel %vm924_vm5, %v974_v44, %v975_v1 }
 0x232   :  { %v977_v10 = vsel %vm924_vm5, %v975_v1, %v2790_v5  ;;  %v716_v2 = vsel %vm664_vm6, %v714_v54, %v715_v56  ;;  %v717_v17 = vsel %vm664_vm6, %v715_v56, %v2796_v9 }
 0x233   :  { %v1777_v48 = vadd.f32 %v3228_v41, %v1695_v21  ;;  %v2423_v14 = vpack.i.bf16 %v977_v10, %v976_v8  ;;  %2247 = vmatmul.msk.bf16.gmra.mxu3 %vm1184_vm7, %v1287_v3  ;;  %v2428_v22 = vpack.i.bf16 %v717_v17, %v716_v2  ;;  %v871_v3 = vsel %vm826_vm14, %v869_v38, %v3000_v34 }
 0x234   :  { %1558 = vmatmul.bf16.gmra.mxu1 %v1276_v46  ;;  %1647 = vmatmul.bf16.gmra.mxu2 %v1277_v62 }
 0x235   :  { %v1809_v24 = vmax.f32 %v1777_v48, 0.0  ;;  %2424 = vrot.lane.b32.xlu1 %v2423_v14, %s2626_s20  ;;  %2429 = vrot.lane.b32.xlu2 %v2428_v22, %s2626_s20  ;;  %v3264_v26 = vpop.f32.mrf.mxu0  ;;  %v2415_v17 = vpop.permute.xlu2 %2414 }
 0x236   :  { %v1608_v25 = vpop.f32.mrf.mxu2  ;;  %v1140_v47 = vrot.slane %v3264_v26, 4  ;;  %v978_v43 = vrot.slane %v3264_v26, 3  ;;  %v718_v13 = vrot.slane %v3264_v26, 1 }
 0x237   :  { %v1843_v27 = vmul.f32 %v3259_v52, %v1809_v24  ;;  %v1609_v29 = vadd.f32 %v1608_v25, %v1519_v58  ;;  %v3309_v37 = vpop.f32.mrf.mxu3 }
 0x239   :  { %v1874_v30 = vmax.f32 %v1842_v16, %v1843_v27  ;;  %v1521_v31 = vpop.f32.mrf.mxu1  ;;  %v1698_v11 = vadd.f32 %v3200_v61, %v1609_v29 }
 0x23b   :  { %v1875_v51 = vrot.slane %v1874_v30, 4  ;;  %v1778_v61 = vadd.f32 %v3228_v41, %v1698_v11 }
 0x23d   :  { %v3274_v40 = vpop.f32.mrf.mxu0  ;;  %v2405_v33 = vpop.permute.xlu0 %2404  ;;  %v1876_v42 = vmax.f32 %v1874_v30, %v1875_v51  ;;  %v1810_v12 = vmax.f32 %v1778_v61, 0.0  ;;  %v872_v30 = vrot.slane %v3113_v53, 2  ;;  %v2416_v51 = vunpack.i.l.bf16 %v2415_v17 }
 0x23e   :  { %v2410_v55 = vpop.permute.xlu1 %2409  ;;  %v1610_v39 = vpop.f32.mrf.mxu2  ;;  %v1141_v44 = vrot.slane %v3274_v40, 4  ;;  %v2407_v49 = vunpack.i.h.bf16 %v2405_v33  ;;  %v2406_v6 = vunpack.i.l.bf16 %v2405_v33  ;;  %v979_v1 = vrot.slane %v3274_v40, 3 }
 0x23f   :  { %v2412_v46 = vunpack.i.h.bf16 %v2410_v55  ;;  %v2411_v28 = vunpack.i.l.bf16 %v2410_v55  ;;  %v1611_v50 = vadd.f32 %v1610_v39, %v1521_v31  ;;  %v719_v56 = vrot.slane %v3274_v40, 1 }
 0x240   :  { %v1142_v19 = vsel %vm1086_vm4, %v1140_v47, %v1141_v44  ;;  %v1143_v57 = vsel %vm1086_vm4, %v1141_v44, %v2787_v4  ;;  %v980_v62 = vsel %vm924_vm5, %v978_v43, %v979_v1  ;;  %v981_v8 = vsel %vm924_vm5, %v979_v1, %v2790_v5 }
 0x241   :  { %v1524_v54 = vpop.f32.mrf.mxu1  ;;  %v1205_v21 = vsel %vm1184_vm7, %v3075_v0, %v2411_v28  ;;  %v1206_v58 = vsel %vm1184_vm7, %v3091_v32, %v2412_v46  ;;  %v1700_v59 = vadd.f32 %v3207_v15, %v1611_v50  ;;  %v1290_v60 = vpack.c.bf16 %v1143_v57, %v1142_v19 }
 0x242   :  { %v720_v10 = vsel %vm664_vm6, %v718_v13, %v719_v56  ;;  %v721_v2 = vsel %vm664_vm6, %v719_v56, %v2796_v9  ;;  %v1279_v0 = vpack.c.bf16 %v1206_v58, %v1205_v21  ;;  %v2433_v15 = vpack.i.bf16 %v981_v8, %v980_v62  ;;  %v3326_v58 = vpop.f32.mrf.mxu3 }
 0x243   :  { %v1779_v32 = vadd.f32 %v3228_v41, %v1700_v59  ;;  %2248 = vmatmul.msk.bf16.gmra.mxu3 %vm1184_vm7, %v1290_v60  ;;  %v2438_v48 = vpack.i.bf16 %v721_v2, %v720_v10  ;;  %v1877_v14 = vrot.slane %v1876_v42, 2  ;;  %v1237_v22 = vsel %vm1184_vm7, %v870_v7, %v2406_v6 }
 0x244   :  { %1563 = vmatmul.bf16.gmra.mxu1 %v1279_v0  ;;  %v1238_v24 = vsel %vm1184_vm7, %v871_v3, %v2407_v49  ;;  %2434 = vrot.lane.b32.xlu0 %v2433_v15, %s2626_s20  ;;  %v873_v31 = vrot.slane %v3128_v20, 2  ;;  %v1844_v11 = vmul.f32 %v3257_v45, %v1810_v12  ;;  %v2417_v46 = vunpack.i.h.bf16 %v2415_v17 }
 0x245   :  { %v3303_v16 = vpop.f32.mrf.mxu0  ;;  %v1811_v27 = vmax.f32 %v1779_v32, 0.0  ;;  %2439 = vrot.lane.b32.xlu1 %v2438_v48, %s2626_s20  ;;  %v1280_v25 = vpack.c.bf16 %v1238_v24, %v1237_v22  ;;  %v1878_v7 = vmax.f32 %v1876_v42, %v1877_v14 }
 0x246   :  { %v1613_v29 = vpop.f32.mrf.mxu2  ;;  %v874_v43 = vsel %vm826_vm14, %v872_v30, %v873_v31  ;;  %v875_v61 = vsel %vm826_vm14, %v873_v31, %v3000_v34  ;;  %v1144_v6 = vrot.slane %v3303_v16, 4  ;;  %v722_v21 = vrot.slane %v3303_v16, 1 }
 0x247   :  { %v1614_v38 = vadd.f32 %v1613_v29, %v1524_v54  ;;  %v1845_v47 = vmul.f32 %v3259_v52, %v1811_v27  ;;  %1652 = vmatmul.bf16.gmra.mxu2 %v1280_v25  ;;  %v1239_v44 = vsel %vm1184_vm7, %v874_v43, %v2416_v51  ;;  %v1879_v49 = vrot.slane %v1878_v7, 1 }
 0x248   :  { %v982_v54 = vrot.slane %v3303_v16, 3 }
 0x249   :  { %v1526_v55 = vpop.f32.mrf.mxu1  ;;  %v1703_v28 = vadd.f32 %v3219_v18, %v1614_v38  ;;  %v1881_v33 = vmax.f32 %v1844_v11, %v1845_v47  ;;  %v1240_v18 = vsel %vm1184_vm7, %v875_v61, %v2417_v46  ;;  %v1880_v47 = vmax.f32 %v1878_v7, %v1879_v49 }
 0x24a   :  { %v1283_v46 = vpack.c.bf16 %v1240_v18, %v1239_v44 }
 0x24b   :  { %v1780_v39 = vadd.f32 %v3228_v41, %v1703_v28  ;;  %v1882_v13 = vrot.slane %v1881_v33, 4 }
 0x24d   :  { %v3320_v50 = vpop.f32.mrf.mxu0  ;;  %v1883_v1 = vmax.f32 %v1881_v33, %v1882_v13  ;;  %v1812_v56 = vmax.f32 %v1780_v39, 0.0  ;;  %v3353_v13 = vpop.f32.mrf.mxu3 }
 0x24e   :  { %v2420_v42 = vpop.permute.xlu0 %2419  ;;  %v1145_v19 = vrot.slane %v3320_v50, 4  ;;  %v1615_v57 = vpop.f32.mrf.mxu2  ;;  %v983_v3 = vrot.slane %v3320_v50, 3  ;;  %v723_v12 = vrot.slane %v3320_v50, 1 }
 0x24f   :  { %v2422_v59 = vunpack.i.h.bf16 %v2420_v42  ;;  %v2421_v60 = vunpack.i.l.bf16 %v2420_v42  ;;  %v1616_v62 = vadd.f32 %v1615_v57, %v1526_v55  ;;  %v1884_v8 = vrot.slane %v1883_v1, 2 }
 0x250   :  { %v1146_v2 = vsel %vm1086_vm4, %v1144_v6, %v1145_v19  ;;  %v1147_v0 = vsel %vm1086_vm4, %v1145_v19, %v2787_v4  ;;  %v984_v48 = vsel %vm924_vm5, %v982_v54, %v983_v3  ;;  %v985_v14 = vsel %vm924_vm5, %v983_v3, %v2790_v5 }
 0x251   :  { %v1529_v10 = vpop.f32.mrf.mxu1  ;;  %v1705_v32 = vadd.f32 %v3252_v23, %v1616_v62  ;;  %v1293_v15 = vpack.c.bf16 %v1147_v0, %v1146_v2  ;;  %v1885_v17 = vmax.f32 %v1883_v1, %v1884_v8  ;;  %v2443_v22 = vpack.i.bf16 %v985_v14, %v984_v48 }
 0x252   :  { %v724_v24 = vsel %vm664_vm6, %v722_v21, %v723_v12  ;;  %v725_v27 = vsel %vm664_vm6, %v723_v12, %v2796_v9  ;;  %v1207_v30 = vsel %vm1184_vm7, %v3113_v53, %v2421_v60  ;;  %v1208_v23 = vsel %vm1184_vm7, %v3128_v20, %v2422_v59 }
 0x253   :  { %v1781_v25 = vadd.f32 %v3228_v41, %v1705_v32  ;;  %v2448_v29 = vpack.i.bf16 %v725_v27, %v724_v24  ;;  %v1886_v31 = vrot.slane %v1885_v17, 1  ;;  %2249 = vmatmul.msk.bf16.gmra.mxu3 %vm1184_vm7, %v1293_v15  ;;  %2444 = vrot.lane.b32.xlu2 %v2443_v22, %s2626_s20  ;;  %v1282_v38 = vpack.c.bf16 %v1208_v23, %v1207_v30  ;;  %v2001_v27 = vld [vmem:[#allocation10 + $0x78] sm:$0xff] }
 0x254   :  { %v1846_v28 = vmul.f32 %v3257_v45, %v1812_v56  ;;  %2045 = vmatpush.msrb.mxu0 %v2001_v27 }
 0x255   :  { %v1813_v51 = vmax.f32 %v1781_v25, 0.0  ;;  %2449 = vrot.lane.b32.xlu0 %v2448_v29, %s2626_s20  ;;  %v1887_v55 = vmax.f32 %v1885_v17, %v1886_v31  ;;  %1568 = vmatmul.bf16.gmra.mxu1 %v1282_v38  ;;  %v1717_v14 = vpop.f32.mrf.mxu3 }
 0x256   :  { %v3348_v11 = vpop.f32.mrf.mxu0 }
 0x257   :  { %v1618_v53 = vpop.f32.mrf.mxu2  ;;  %v1847_v20 = vmul.f32 %v3259_v52, %v1813_v51  ;;  %1657 = vmatmul.bf16.gmra.mxu2 %v1283_v46  ;;  %v2023_v43 = vsel %vm2022_vm0, %v1887_v55, %v1880_v47  ;;  %v1148_v49 = vrot.slane %v3348_v11, 4  ;;  %v986_v1 = vrot.slane %v3348_v11, 3 }
 0x258   :  { %v1619_v33 = vadd.f32 %v1618_v53, %v1529_v10 }
 0x259   :  { %v1531_v39 = vpop.f32.mrf.mxu1  ;;  %v1888_v61 = vmax.f32 %v1846_v28, %v1847_v20  ;;  %v2000_v20 = vld [vmem:[#allocation10 + $0x70] sm:$0xff] }
 0x25a   :  { %v1708_v6 = vadd.f32 %v3271_v35, %v1619_v33  ;;  %v726_v35 = vrot.slane %v3348_v11, 1  ;;  %2046 = vmatpush.msrb.mxu0 %v2000_v20 }
 0x25b   :  { %v1889_v42 = vrot.slane %v1888_v61, 4 }
 0x25c   :  { %v1782_v21 = vadd.f32 %v3228_v41, %v1708_v6 }
 0x25d   :  { %v1890_v7 = vmax.f32 %v1888_v61, %v1889_v42  ;;  %v1719_v51 = vpop.f32.mrf.mxu3 }
 0x25e   :  { %v3357_v44 = vpop.f32.mrf.mxu0  ;;  %v1814_v22 = vmax.f32 %v1782_v21, 0.0 }
 0x25f   :  { %v1149_v54 = vrot.slane %v3357_v44, 4  ;;  %v1620_v18 = vpop.f32.mrf.mxu2  ;;  %v987_v56 = vrot.slane %v3357_v44, 3  ;;  %v727_v19 = vrot.slane %v3357_v44, 1  ;;  %v1891_v57 = vrot.slane %v1890_v7, 2 }
 0x260   :  { %v1621_v59 = vadd.f32 %v1620_v18, %v1531_v39 }
 0x261   :  { %v1534_v60 = vpop.f32.mrf.mxu1  ;;  %v1150_v62 = vsel %vm1086_vm4, %v1148_v49, %v1149_v54  ;;  %v1151_v3 = vsel %vm1086_vm4, %v1149_v54, %v2787_v4  ;;  %v988_v8 = vsel %vm924_vm5, %v986_v1, %v987_v56  ;;  %v989_v10 = vsel %vm924_vm5, %v987_v56, %v2790_v5  ;;  %v1999_v49 = vld [vmem:[#allocation10 + $0x68] sm:$0xff]  ;;  %v1998_v1 = vld [vmem:[#allocation10 + $0x60] sm:$0xff] }
 0x262   :  { %v1892_v2 = vmax.f32 %v1890_v7, %v1891_v57  ;;  %v1710_v0 = vadd.f32 %v3309_v37, %v1621_v59  ;;  %v1296_v12 = vpack.c.bf16 %v1151_v3, %v1150_v62  ;;  %v2453_v32 = vpack.i.bf16 %v989_v10, %v988_v8  ;;  %2047 = vmatpush.msrb.mxu0 %v1999_v49 }
 0x263   :  { %v728_v15 = vsel %vm664_vm6, %v726_v35, %v727_v19  ;;  %v729_v48 = vsel %vm664_vm6, %v727_v19, %v2796_v9  ;;  %vm2024_vm4 = vcmask 1042434   ;;  %v1848_v9 = vmul.f32 %v3257_v45, %v1814_v22  ;;  %v1997_v19 = vld [vmem:[#allocation10 + $0x58] sm:$0xff]  ;;  %v1996_v35 = vld [vmem:[#allocation10 + $0x50] sm:$0xff] }
 0x264   :  { %v1893_v17 = vrot.slane %v1892_v2, 1  ;;  %v1783_v4 = vadd.f32 %v3228_v41, %v1710_v0  ;;  %2454 = vrot.lane.b32.xlu1 %v2453_v32, %s2626_s20  ;;  %v2458_v24 = vpack.i.bf16 %v729_v48, %v728_v15  ;;  %2250 = vmatmul.msk.bf16.gmra.mxu3 %vm1184_vm7, %v1296_v12  ;;  %vm2026_vm5 = vcmask 1043459   ;;  %v1994_v15 = vld [vmem:[#allocation10 + $0x40] sm:$0xff] }
 0x265   :  { %v1722_v6 = vpop.f32.mrf.mxu3  ;;  %2048 = vmatpush.msrb.mxu0 %v1998_v1  ;;  %vm2028_vm6 = vcmask 1044484  }
 0x266   :  { %v1894_v5 = vmax.f32 %v1892_v2, %v1893_v17  ;;  %v1815_v37 = vmax.f32 %v1783_v4, 0.0  ;;  %2459 = vrot.lane.b32.xlu2 %v2458_v24, %s2626_s20  ;;  %v1995_v2 = vld [vmem:[#allocation10 + $0x48] sm:$0xff] }
 0x267   :  { %v1623_v25 = vpop.f32.mrf.mxu2  ;;  %2049 = vmatpush.msrb.mxu0 %v1997_v19 }
 0x268   :  { %v1849_v29 = vmul.f32 %v3259_v52, %v1815_v37  ;;  %v2025_v30 = vsel %vm2024_vm4, %v1894_v5, %v2023_v43  ;;  %v1624_v59 = vadd.f32 %v1623_v25, %v1534_v60  ;;  %v1993_v60 = vld [vmem:[#allocation10 + $0x38] sm:$0xff]  ;;  %v1992_v37 = vld [vmem:[#allocation10 + $0x30] sm:$0xff]  ;;  %v1991_v25 = vld [vmem:[#allocation10 + $0x28] sm:$0xff] }
 0x269   :  { %v1536_v23 = vpop.f32.mrf.mxu1  ;;  %2050 = vmatpush.msrb.mxu0 %v1996_v35  ;;  %v1987_v35 = vld [vmem:[#allocation10 + $0x8] sm:$0xff] }
 0x26a   :  { %v1895_v31 = vmax.f32 %v1848_v9, %v1849_v29  ;;  %v1713_v32 = vadd.f32 %v3326_v58, %v1624_v59 }
 0x26b   :  { %2051 = vmatpush.msrb.mxu0 %v1995_v2 }
 0x26c   :  { %v1896_v38 = vrot.slane %v1895_v31, 4  ;;  %v1784_v27 = vadd.f32 %v3228_v41, %v1713_v32 }
 0x26d   :  { %v1724_v18 = vpop.f32.mrf.mxu3  ;;  %2052 = vmatpush.msrb.mxu0 %v1994_v15 }
 0x26e   :  { %v1897_v47 = vmax.f32 %v1895_v31, %v1896_v38 }
 0x26f   :  { %v1625_v55 = vpop.f32.mrf.mxu2  ;;  %2053 = vmatpush.msrb.mxu0 %v1993_v60 }
 0x270   :  { %v1898_v46 = vrot.slane %v1897_v47, 2  ;;  %v1626_v56 = vadd.f32 %v1625_v55, %v1536_v23  ;;  %v1816_v55 = vmax.f32 %v1784_v27, 0.0 }
 0x271   :  { %v1539_v53 = vpop.f32.mrf.mxu1  ;;  %2054 = vmatpush.msrb.mxu0 %v1992_v37 }
 0x272   :  { %v1899_v28 = vmax.f32 %v1897_v47, %v1898_v46  ;;  %v1715_v10 = vadd.f32 %v3353_v13, %v1626_v56  ;;  %v1988_v56 = vld [vmem:[#allocation10 + $0x10] sm:$0xff] }
 0x273   :  { %2055 = vmatpush.msrb.mxu0 %v1991_v25 }
 0x274   :  { %v1900_v33 = vrot.slane %v1899_v28, 1  ;;  %v1785_v22 = vadd.f32 %v3228_v41, %v1715_v10  ;;  %v1986_v10 = vld [vmem:[#allocation10] sm:$0xff] }
 0x275   :  { %v1727_v12 = vpop.f32.mrf.mxu3 }
 0x276   :  { %v1901_v39 = vmax.f32 %v1899_v28, %v1900_v33  ;;  %v1817_v23 = vmax.f32 %v1785_v22, 0.0  ;;  %v1990_v28 = vld [vmem:[#allocation10 + $0x20] sm:$0xff] }
 0x277   :  { %v1628_v61 = vpop.f32.mrf.mxu2  ;;  %2056 = vmatpush.msrb.mxu0 %v1990_v28 }
 0x278   :  { %v3383_v42 = vsel %vm2026_vm5, %v1901_v39, %v2025_v30  ;;  %v1629_v62 = vadd.f32 %v1628_v61, %v1539_v53  ;;  %v1851_v61 = vmul.f32 %v3259_v52, %v1817_v23 }
 0x279   :  { %v1541_v43 = vpop.f32.mrf.mxu1 }
 0x27a   :  { %v1718_v48 = vadd.f32 %v1717_v14, %v1629_v62 }
 0x27c   :  { %v1786_v9 = vadd.f32 %v3228_v41, %v1718_v48 }
 0x27d   :  { %v1729_v39 = vpop.f32.mrf.mxu3 }
 0x27e   :  { %v1818_v20 = vmax.f32 %v1786_v9, 0.0 }
 0x27f   :  { %v1630_v7 = vpop.f32.mrf.mxu2 }
 0x280   :  { %v1631_v57 = vadd.f32 %v1630_v7, %v1541_v43  ;;  %v1989_v43 = vld [vmem:[#allocation10 + $0x18] sm:$0xff]  ;;  %v1852_v19 = vmul.f32 %v3257_v45, %v1818_v20 }
 0x281   :  { %v1544_v54 = vpop.f32.mrf.mxu1  ;;  %2057 = vmatpush.msrb.mxu0 %v1989_v43 }
 0x282   :  { %v1720_v0 = vadd.f32 %v1719_v51, %v1631_v57 }
 0x283   :  { %2058 = vmatpush.msrb.mxu0 %v1988_v56 }
 0x284   :  { %v1787_v4 = vadd.f32 %v3228_v41, %v1720_v0 }
 0x285   :  { %2059 = vmatpush.msrb.mxu0 %v1987_v35 }
 0x286   :  { %v1819_v38 = vmax.f32 %v1787_v4, 0.0 }
 0x287   :  { %v1633_v21 = vpop.f32.mrf.mxu2  ;;  %2060 = vmatpush.msrb.mxu0 %v1986_v10 }
 0x288   :  { %v1634_v3 = vadd.f32 %v1633_v21, %v1544_v54  ;;  %v1853_v7 = vmul.f32 %v3259_v52, %v1819_v38  ;;  %v1850_v54 = vmul.f32 %v3257_v45, %v1816_v55 }
 0x289   :  { %v1546_v8 = vpop.f32.mrf.mxu1 }
 0x28a   :  { %v1723_v17 = vadd.f32 %v1722_v6, %v1634_v3  ;;  %v1902_v59 = vmax.f32 %v1850_v54, %v1851_v61  ;;  %v1909_v62 = vmax.f32 %v1852_v19, %v1853_v7 }
 0x28c   :  { %v1788_v58 = vadd.f32 %v3228_v41, %v1723_v17  ;;  %v1903_v2 = vrot.slane %v1902_v59, 4  ;;  %v1910_v0 = vrot.slane %v1909_v62, 4  ;;  %v1732_v17 = vpop.f32.mrf.mxu3 }
 0x28e   :  { %v1820_v33 = vmax.f32 %v1788_v58, 0.0  ;;  %v1904_v4 = vmax.f32 %v1902_v59, %v1903_v2  ;;  %v1911_v27 = vmax.f32 %v1909_v62, %v1910_v0  ;;  %v876_v58 = vrot.slane %v3215_v36, 2 }
 0x28f   :  { %v1635_v24 = vpop.f32.mrf.mxu2  ;;  %v2430_v13 = vpop.permute.xlu2 %2429 }
 0x290   :  { %v1636_v5 = vadd.f32 %v1635_v24, %v1546_v8  ;;  %v2432_v14 = vunpack.i.h.bf16 %v2430_v13  ;;  %v2431_v29 = vunpack.i.l.bf16 %v2430_v13  ;;  %v1854_v57 = vmul.f32 %v3257_v45, %v1820_v33 }
 0x291   :  { %v1549_v30 = vpop.f32.mrf.mxu1  ;;  %v1905_v25 = vrot.slane %v1904_v4, 2 }
 0x292   :  { %v1725_v31 = vadd.f32 %v1724_v18, %v1636_v5  ;;  %v1209_v51 = vsel %vm1184_vm7, %v3215_v36, %v2431_v29  ;;  %v1210_v47 = vsel %vm1184_vm7, %v3234_v63, %v2432_v14  ;;  %v1912_v14 = vrot.slane %v1911_v27, 2 }
 0x293   :  { %v1285_v53 = vpack.c.bf16 %v1210_v47, %v1209_v51  ;;  %v1906_v20 = vmax.f32 %v1904_v4, %v1905_v25 }
 0x294   :  { %v1789_v46 = vadd.f32 %v3228_v41, %v1725_v31  ;;  %v1734_v28 = vpop.f32.mrf.mxu3  ;;  %v1913_v61 = vmax.f32 %v1911_v27, %v1912_v14 }
 0x295   :  { %1573 = vmatmul.bf16.gmra.mxu1 %v1285_v53  ;;  %v1907_v54 = vrot.slane %v1906_v20, 1 }
 0x296   :  { %v1821_v6 = vmax.f32 %v1789_v46, 0.0  ;;  %v1914_v56 = vrot.slane %v1913_v61, 1 }
 0x297   :  { %v1638_v49 = vpop.f32.mrf.mxu2 }
 0x298   :  { %v1855_v18 = vmul.f32 %v3259_v52, %v1821_v6  ;;  %v1639_v1 = vadd.f32 %v1638_v49, %v1549_v30 }
 0x299   :  { %v1551_v21 = vpop.f32.mrf.mxu1 }
 0x29a   :  { %v1916_v3 = vmax.f32 %v1854_v57, %v1855_v18  ;;  %v1728_v8 = vadd.f32 %v1727_v12, %v1639_v1  ;;  %v877_v12 = vrot.slane %v3234_v63, 2 }
 0x29c   :  { %v1917_v32 = vrot.slane %v1916_v3, 4  ;;  %v1790_v15 = vadd.f32 %v3228_v41, %v1728_v8  ;;  %v878_v53 = vsel %vm826_vm14, %v876_v58, %v877_v12  ;;  %v879_v63 = vsel %vm826_vm14, %v877_v12, %v3000_v34  ;;  %v1737_v2 = vpop.f32.mrf.mxu3 }
 0x29d   :  { %v1915_v8 = vmax.f32 %v1913_v61, %v1914_v56  ;;  %v880_v12 = vrot.slane %v3264_v26, 2 }
 0x29e   :  { %v1918_v13 = vmax.f32 %v1916_v3, %v1917_v32  ;;  %v1822_v5 = vmax.f32 %v1790_v15, 0.0  ;;  %v1908_v3 = vmax.f32 %v1906_v20, %v1907_v54 }
 0x29f   :  { %v1640_v48 = vpop.f32.mrf.mxu2 }
 0x2a0   :  { %v1641_v22 = vadd.f32 %v1640_v48, %v1551_v21  ;;  %v1919_v29 = vrot.slane %v1918_v13, 2  ;;  %v1856_v30 = vmul.f32 %v3257_v45, %v1822_v5 }
 0x2a1   :  { %v1554_v60 = vpop.f32.mrf.mxu1 }
 0x2a2   :  { %v1730_v24 = vadd.f32 %v1729_v39, %v1641_v22  ;;  %v1920_v49 = vmax.f32 %v1918_v13, %v1919_v29  ;;  %v2029_v22 = vsel %vm2028_vm6, %v1908_v3, %v3383_v42 }
 0x2a4   :  { %v1791_v37 = vadd.f32 %v3228_v41, %v1730_v24  ;;  %v1921_v21 = vrot.slane %v1920_v49, 1  ;;  %v2031_v24 = vsel %vm2030_vm12, %v1915_v8, %v2029_v22 }
 0x2a6   :  { %v1823_v9 = vmax.f32 %v1791_v37, 0.0  ;;  %v1922_v15 = vmax.f32 %v1920_v49, %v1921_v21 }
 0x2a7   :  { %v2425_v23 = vpop.permute.xlu1 %2424  ;;  %v1643_v31 = vpop.f32.mrf.mxu2 }
 0x2a8   :  { %v1857_v38 = vmul.f32 %v3259_v52, %v1823_v9  ;;  %v2427_v51 = vunpack.i.h.bf16 %v2425_v23  ;;  %v2426_v47 = vunpack.i.l.bf16 %v2425_v23  ;;  %v1644_v55 = vadd.f32 %v1643_v31, %v1554_v60 }
 0x2a9   :  { %v1556_v46 = vpop.f32.mrf.mxu1  ;;  %v881_v60 = vrot.slane %v3274_v40, 2  ;;  %v2033_v37 = vsel %vm2032_vm13, %v1922_v15, %v2031_v24 }
 0x2aa   :  { %v1923_v36 = vmax.f32 %v1856_v30, %v1857_v38  ;;  %v1241_v33 = vsel %vm1184_vm7, %v878_v53, %v2426_v47  ;;  %v1242_v39 = vsel %vm1184_vm7, %v879_v63, %v2427_v51  ;;  %v1733_v7 = vadd.f32 %v1732_v17, %v1644_v55 }
 0x2ab   :  { %v1286_v6 = vpack.c.bf16 %v1242_v39, %v1241_v33  ;;  %v883_v38 = vsel %vm826_vm14, %v881_v60, %v3000_v34 }
 0x2ac   :  { %v1924_v43 = vrot.slane %v1923_v36, 4  ;;  %v1792_v19 = vadd.f32 %v3228_v41, %v1733_v7 }
 0x2ad   :  { %1662 = vmatmul.bf16.gmra.mxu2 %v1286_v6 }
 0x2ae   :  { %v1925_v18 = vmax.f32 %v1923_v36, %v1924_v43  ;;  %v1824_v0 = vmax.f32 %v1792_v19, 0.0  ;;  %v1739_v36 = vpop.f32.mrf.mxu3  ;;  %v2445_v43 = vpop.permute.xlu2 %2444 }
 0x2af   :  { %v1645_v1 = vpop.f32.mrf.mxu2 }
 0x2b0   :  { %v1646_v57 = vadd.f32 %v1645_v1, %v1556_v46  ;;  %v1926_v59 = vrot.slane %v1925_v18, 2  ;;  %v1858_v27 = vmul.f32 %v3257_v45, %v1824_v0  ;;  %v882_v46 = vsel %vm826_vm14, %v880_v12, %v881_v60 }
 0x2b1   :  { %v1559_v62 = vpop.f32.mrf.mxu1  ;;  %v2446_v1 = vunpack.i.l.bf16 %v2445_v43 }
 0x2b2   :  { %v1735_v35 = vadd.f32 %v1734_v28, %v1646_v57  ;;  %v1927_v10 = vmax.f32 %v1925_v18, %v1926_v59  ;;  %v884_v18 = vrot.slane %v3303_v16, 2  ;;  %v2447_v57 = vunpack.i.h.bf16 %v2445_v43 }
 0x2b4   :  { %v1793_v32 = vadd.f32 %v3228_v41, %v1735_v35  ;;  %v1928_v48 = vrot.slane %v1927_v10, 1 }
 0x2b6   :  { %v1825_v17 = vmax.f32 %v1793_v32, 0.0  ;;  %v1929_v4 = vmax.f32 %v1927_v10, %v1928_v48  ;;  %v2435_v9 = vpop.permute.xlu0 %2434  ;;  %v1742_v59 = vpop.f32.mrf.mxu3 }
 0x2b7   :  { %v1648_v5 = vpop.f32.mrf.mxu2  ;;  %v2440_v25 = vpop.permute.xlu1 %2439  ;;  %v2437_v23 = vunpack.i.h.bf16 %v2435_v9  ;;  %v2436_v31 = vunpack.i.l.bf16 %v2435_v9 }
 0x2b8   :  { %v1859_v13 = vmul.f32 %v3259_v52, %v1825_v17  ;;  %v1649_v58 = vadd.f32 %v1648_v5, %v1559_v62  ;;  %v2035_v42 = vsel %vm2034_vm15, %v1929_v4, %v2033_v37  ;;  %v2442_v29 = vunpack.i.h.bf16 %v2440_v25 }
 0x2b9   :  { %v2441_v30 = vunpack.i.l.bf16 %v2440_v25  ;;  %2061 = vmatmul.f32.vlgmr.msrb.gmra.mxu0 %v2035_v42  ;;  %v1561_v51 = vpop.f32.mrf.mxu1  ;;  %v1244_v53 = vsel %vm1184_vm7, %v883_v38, %v2437_v23  ;;  %v1243_v20 = vsel %vm1184_vm7, %v882_v46, %v2436_v31 }
 0x2ba   :  { %v1930_v14 = vmax.f32 %v1858_v27, %v1859_v13  ;;  %v1212_v55 = vsel %vm1184_vm7, %v3274_v40, %v2442_v29  ;;  %v1738_v63 = vadd.f32 %v1737_v2, %v1649_v58  ;;  %v1289_v33 = vpack.c.bf16 %v1244_v53, %v1243_v20 }
 0x2bb   :  { %v1211_v47 = vsel %vm1184_vm7, %v3264_v26, %v2441_v30  ;;  %v885_v40 = vrot.slane %v3320_v50, 2 }
 0x2bc   :  { %v1288_v28 = vpack.c.bf16 %v1212_v55, %v1211_v47  ;;  %v1794_v61 = vadd.f32 %v3228_v41, %v1738_v63  ;;  %v1931_v26 = vrot.slane %v1930_v14, 4 }
 0x2bd   :  { %1667 = vmatmul.bf16.gmra.mxu2 %v1289_v33  ;;  %v886_v62 = vsel %vm826_vm14, %v884_v18, %v885_v40  ;;  %v887_v32 = vsel %vm826_vm14, %v885_v40, %v3000_v34 }
 0x2be   :  { %1578 = vmatmul.bf16.gmra.mxu1 %v1288_v28  ;;  %v1826_v49 = vmax.f32 %v1794_v61, 0.0  ;;  %v1932_v56 = vmax.f32 %v1930_v14, %v1931_v26  ;;  %v1245_v15 = vsel %vm1184_vm7, %v886_v62, %v2446_v1  ;;  %v1246_v60 = vsel %vm1184_vm7, %v887_v32, %v2447_v57  ;;  %v1744_v42 = vpop.f32.mrf.mxu3 }
 0x2bf   :  { %v1650_v39 = vpop.f32.mrf.mxu2  ;;  %v1292_v37 = vpack.c.bf16 %v1246_v60, %v1245_v15 }
 0x2c0   :  { %v1651_v6 = vadd.f32 %v1650_v39, %v1561_v51  ;;  %v1860_v3 = vmul.f32 %v3257_v45, %v1826_v49  ;;  %v1933_v0 = vrot.slane %v1932_v56, 2  ;;  %v888_v51 = vrot.slane %v3348_v11, 2 }
 0x2c1   :  { %v1564_v19 = vpop.f32.mrf.mxu1 }
 0x2c2   :  { %v1740_v7 = vadd.f32 %v1739_v36, %v1651_v6  ;;  %v1934_v5 = vmax.f32 %v1932_v56, %v1933_v0 }
 0x2c4   :  { %v1795_v54 = vadd.f32 %v3228_v41, %v1740_v7  ;;  %v1935_v14 = vrot.slane %v1934_v5, 1 }
 0x2c6   :  { %v1827_v21 = vmax.f32 %v1795_v54, 0.0  ;;  %v1936_v47 = vmax.f32 %v1934_v5, %v1935_v14  ;;  %v1747_v1 = vpop.f32.mrf.mxu3 }
 0x2c7   :  { %v2450_v35 = vpop.permute.xlu0 %2449 }
 0x2c8   :  { %v1861_v8 = vmul.f32 %v3259_v52, %v1827_v21  ;;  %v2452_v10 = vunpack.i.h.bf16 %v2450_v35  ;;  %v2451_v2 = vunpack.i.l.bf16 %v2450_v35 }
 0x2c9   :  { %v1566_v9 = vpop.f32.mrf.mxu1 }
 0x2ca   :  { %v1937_v48 = vmax.f32 %v1860_v3, %v1861_v8  ;;  %v1213_v17 = vsel %vm1184_vm7, %v3303_v16, %v2451_v2  ;;  %v1214_v22 = vsel %vm1184_vm7, %v3320_v50, %v2452_v10  ;;  %v1653_v4 = vpop.f32.mrf.mxu2  ;;  %v2460_v16 = vpop.permute.xlu2 %2459  ;;  %v889_v50 = vrot.slane %v3357_v44, 2 }
 0x2cb   :  { %v1291_v24 = vpack.c.bf16 %v1214_v22, %v1213_v17  ;;  %v1654_v13 = vadd.f32 %v1653_v4, %v1564_v19  ;;  %v2462_v55 = vunpack.i.h.bf16 %v2460_v16  ;;  %v2461_v46 = vunpack.i.l.bf16 %v2460_v16 }
 0x2cc   :  { %v1938_v27 = vrot.slane %v1937_v48, 4  ;;  %v890_v39 = vsel %vm826_vm14, %v888_v51, %v889_v50  ;;  %v891_v61 = vsel %vm826_vm14, %v889_v50, %v3000_v34 }
 0x2cd   :  { %v1743_v25 = vadd.f32 %v1742_v59, %v1654_v13  ;;  %1672 = vmatmul.bf16.gmra.mxu2 %v1292_v37  ;;  %v1215_v49 = vsel %vm1184_vm7, %v3348_v11, %v2461_v46  ;;  %v1216_v54 = vsel %vm1184_vm7, %v3357_v44, %v2462_v55 }
 0x2ce   :  { %v1939_v12 = vmax.f32 %v1937_v48, %v1938_v27  ;;  %1583 = vmatmul.bf16.gmra.mxu1 %v1291_v24  ;;  %v1294_v59 = vpack.c.bf16 %v1216_v54, %v1215_v49  ;;  %v1749_v32 = vpop.f32.mrf.mxu3 }
 0x2cf   :  { %v1796_v30 = vadd.f32 %v3228_v41, %v1743_v25 }
 0x2d0   :  { %v1940_v58 = vrot.slane %v1939_v12, 2 }
 0x2d1   :  { %v1828_v33 = vmax.f32 %v1796_v30, 0.0 }
 0x2d2   :  { %v1941_v29 = vmax.f32 %v1939_v12, %v1940_v58  ;;  %v1655_v23 = vpop.f32.mrf.mxu2  ;;  %v1569_v40 = vpop.f32.mrf.mxu1 }
 0x2d3   :  { %v1656_v38 = vadd.f32 %v1655_v23, %v1566_v9  ;;  %v1862_v34 = vmul.f32 %v3257_v45, %v1828_v33 }
 0x2d4   :  { %v1942_v31 = vrot.slane %v1941_v29, 1 }
 0x2d5   :  { %v1745_v28 = vadd.f32 %v1744_v42, %v1656_v38 }
 0x2d6   :  { %v2455_v53 = vpop.permute.xlu1 %2454  ;;  %v1943_v63 = vmax.f32 %v1941_v29, %v1942_v31  ;;  %v1752_v29 = vpop.f32.mrf.mxu3 }
 0x2d7   :  { %v2457_v20 = vunpack.i.h.bf16 %v2455_v53  ;;  %v2456_v36 = vunpack.i.l.bf16 %v2455_v53  ;;  %v1797_v6 = vadd.f32 %v3228_v41, %v1745_v28 }
 0x2d8   :  { %v2036_v7 = vsel %vm2022_vm0, %v1943_v63, %v1936_v47 }
 0x2d9   :  { %v1247_v26 = vsel %vm1184_vm7, %v890_v39, %v2456_v36  ;;  %v1248_v43 = vsel %vm1184_vm7, %v891_v61, %v2457_v20  ;;  %v1829_v18 = vmax.f32 %v1797_v6, 0.0 }
 0x2da   :  { %v1658_v56 = vpop.f32.mrf.mxu2  ;;  %v1295_v19 = vpack.c.bf16 %v1248_v43, %v1247_v26  ;;  %v1571_v11 = vpop.f32.mrf.mxu1 }
 0x2db   :  { %v1863_v57 = vmul.f32 %v3259_v52, %v1829_v18  ;;  %v1659_v21 = vadd.f32 %v1658_v56, %v1569_v40 }
 0x2dd   :  { %v1944_v35 = vmax.f32 %v1862_v34, %v1863_v57  ;;  %v1748_v62 = vadd.f32 %v1747_v1, %v1659_v21  ;;  %1677 = vmatmul.bf16.gmra.mxu2 %v1295_v19  ;;  %v2465_v1 = vld [vmem:[%s3497_s3] ss:$0 sm:$0xff]  ;;  %s2630_s3 = smov [#allocation11]  }
 0x2de   :  { %1588 = vmatmul.bf16.gmra.mxu1 %v1294_v59  ;;  %v1754_v30 = vpop.f32.mrf.mxu3  ;;  %s2074_s30 = sshll.u32 %s2630_s3, 4  ;;  %s2075_s30 = int_to_ptr.vmem [resolvable:$true] %s2074_s30 }
 0x2df   :  { %v1945_v3 = vrot.slane %v1944_v35, 4  ;;  %v1798_v44 = vadd.f32 %v3228_v41, %v1748_v62 }
 0x2e1   :  { %v1946_v8 = vmax.f32 %v1944_v35, %v1945_v3  ;;  %v1830_v22 = vmax.f32 %v1798_v44, 0.0 }
 0x2e2   :  { %v1660_v10 = vpop.f32.mrf.mxu2 }
 0x2e3   :  { %v1947_v2 = vrot.slane %v1946_v8, 2  ;;  %v1661_v0 = vadd.f32 %v1660_v10, %v1571_v11  ;;  %v1864_v27 = vmul.f32 %v3257_v45, %v1830_v22  ;;  %v3476_v45 = vld [vmem:[%s3500_s6] ss:$0 sm:$0xff] }
 0x2e5   :  { %v1948_v15 = vmax.f32 %v1946_v8, %v1947_v2  ;;  %v1750_v48 = vadd.f32 %v1749_v32, %v1661_v0  ;;  %v2466_v0 = vld [vmem:[#allocation8 + $0x8] sm:$0xff] }
 0x2e6   :  { %v1757_v51 = vpop.f32.mrf.mxu3 }
 0x2e7   :  { %v1949_v17 = vrot.slane %v1948_v15, 1  ;;  %v1799_v60 = vadd.f32 %v3228_v41, %v1750_v48 }
 0x2e9   :  { %v1950_v4 = vmax.f32 %v1948_v15, %v1949_v17  ;;  %v1831_v24 = vmax.f32 %v1799_v60, 0.0 }
 0x2eb   :  { %v1865_v13 = vmul.f32 %v3259_v52, %v1831_v24  ;;  %v2037_v5 = vsel %vm2024_vm4, %v1950_v4, %v2036_v7  ;;  %v2467_v4 = vld [vmem:[#allocation8] sm:$0xff] }
 0x2ed   :  { %v1951_v37 = vmax.f32 %v1864_v27, %v1865_v13 }
 0x2ee   :  { %v1759_v53 = vpop.f32.mrf.mxu3 }
 0x2ef   :  { %v1952_v12 = vrot.slane %v1951_v37, 4 }
 0x2f1   :  { %v1953_v25 = vmax.f32 %v1951_v37, %v1952_v12 }
 0x2f3   :  { %v1954_v9 = vrot.slane %v1953_v25, 2 }
 0x2f5   :  { %v1955_v58 = vmax.f32 %v1953_v25, %v1954_v9 }
 0x2f6   :  { %v1762_v20 = vpop.f32.mrf.mxu3 }
 0x2f7   :  { %v1956_v42 = vrot.slane %v1955_v58, 1 }
 0x2f9   :  { %v1957_v14 = vmax.f32 %v1955_v58, %v1956_v42 }
 0x2fb   :  { %v3471_v16 = vsel %vm2026_vm5, %v1957_v14, %v2037_v5 }
 0x2fe   :  { %v1764_v18 = vpop.f32.mrf.mxu3 }
 0x306   :  { %v1767_v60 = vpop.f32.mrf.mxu3 }
 0x312   :  { %v1574_v41 = vpop.f32.mrf.mxu1 }
 0x31a   :  { %v1576_v23 = vpop.f32.mrf.mxu1 }
 0x330   :  { %v1663_v50 = vpop.f32.mrf.mxu2 }
 0x331   :  { %v1664_v39 = vadd.f32 %v1663_v50, %v1574_v41 }
 0x333   :  { %v1753_v40 = vadd.f32 %v1752_v29, %v1664_v39 }
 0x335   :  { %v1800_v57 = vadd.f32 %v2465_v1, %v1753_v40 }
 0x336   :  { %v2062_v52 = vpop.f32.mrf.mxu0 }
 0x337   :  { %v2063_v31 = vadd.f32 %v3476_v45, %v2062_v52  ;;  %v1832_v10 = vmax.f32 %v1800_v57, 0.0 }
 0x338   :  { %v1665_v38 = vpop.f32.mrf.mxu2 }
 0x339   :  { %2068 = vst [vmem:[#allocation11] sm:$0xff] %v2063_v31  ;;  %v1666_v36 = vadd.f32 %v1665_v38, %v1576_v23  ;;  %v1866_v24 = vmul.f32 %v2467_v4, %v1832_v10  ;;  %v1769_v31 = vpop.f32.mrf.mxu3 }
 0x33b   :  { %v1579_v47 = vpop.f32.mrf.mxu1  ;;  %v1755_v26 = vadd.f32 %v1754_v30, %v1666_v36 }
 0x33d   :  { %v1801_v56 = vadd.f32 %v2465_v1, %v1755_v26 }
 0x33f   :  { %v1833_v62 = vmax.f32 %v1801_v56, 0.0 }
 0x340   :  { %v1668_v55 = vpop.f32.mrf.mxu2 }
 0x341   :  { %v1669_v6 = vadd.f32 %v1668_v55, %v1579_v47  ;;  %v1867_v32 = vmul.f32 %v2466_v0, %v1833_v62 }
 0x343   :  { %v1581_v46 = vpop.f32.mrf.mxu1  ;;  %v1758_v54 = vadd.f32 %v1757_v51, %v1669_v6  ;;  %v1958_v12 = vmax.f32 %v1866_v24, %v1867_v32 }
 0x345   :  { %v1802_v59 = vadd.f32 %v2465_v1, %v1758_v54  ;;  %v1959_v14 = vrot.slane %v1958_v12, 4 }
 0x347   :  { %v1834_v2 = vmax.f32 %v1802_v59, 0.0  ;;  %v1960_v38 = vmax.f32 %v1958_v12, %v1959_v14 }
 0x348   :  { %v1670_v63 = vpop.f32.mrf.mxu2 }
 0x349   :  { %v1671_v33 = vadd.f32 %v1670_v63, %v1581_v46  ;;  %v1868_v13 = vmul.f32 %v2467_v4, %v1834_v2  ;;  %v1961_v63 = vrot.slane %v1960_v38, 2 }
 0x34b   :  { %v1584_v28 = vpop.f32.mrf.mxu1  ;;  %v1760_v7 = vadd.f32 %v1759_v53, %v1671_v33 }
 0x34d   :  { %v1803_v34 = vadd.f32 %v2465_v1, %v1760_v7 }
 0x34f   :  { %v1835_v8 = vmax.f32 %v1803_v34, 0.0 }
 0x350   :  { %v1673_v61 = vpop.f32.mrf.mxu2 }
 0x351   :  { %v1674_v43 = vadd.f32 %v1673_v61, %v1584_v28  ;;  %v1869_v17 = vmul.f32 %v2466_v0, %v1835_v8  ;;  %v1962_v61 = vmax.f32 %v1960_v38, %v1961_v63 }
 0x353   :  { %v1586_v49 = vpop.f32.mrf.mxu1  ;;  %v1763_v19 = vadd.f32 %v1762_v20, %v1674_v43  ;;  %v1965_v9 = vmax.f32 %v1868_v13, %v1869_v17  ;;  %v1963_v40 = vrot.slane %v1962_v61, 1 }
 0x355   :  { %v1804_v3 = vadd.f32 %v2465_v1, %v1763_v19  ;;  %v1966_v29 = vrot.slane %v1965_v9, 4  ;;  %v1964_v19 = vmax.f32 %v1962_v61, %v1963_v40 }
 0x357   :  { %v1836_v15 = vmax.f32 %v1804_v3, 0.0  ;;  %v1967_v51 = vmax.f32 %v1965_v9, %v1966_v29  ;;  %v2039_v59 = vsel %vm2028_vm6, %v1964_v19, %v3471_v16 }
 0x358   :  { %v1675_v21 = vpop.f32.mrf.mxu2 }
 0x359   :  { %v1676_v35 = vadd.f32 %v1675_v21, %v1586_v49  ;;  %v1870_v25 = vmul.f32 %v2467_v4, %v1836_v15  ;;  %v1968_v28 = vrot.slane %v1967_v51, 2 }
 0x35b   :  { %v1765_v11 = vadd.f32 %v1764_v18, %v1676_v35  ;;  %v1589_v48 = vpop.f32.mrf.mxu1  ;;  %v1969_v26 = vmax.f32 %v1967_v51, %v1968_v28 }
 0x35d   :  { %v1805_v44 = vadd.f32 %v2465_v1, %v1765_v11  ;;  %v1970_v49 = vrot.slane %v1969_v26, 1 }
 0x35f   :  { %v1837_v22 = vmax.f32 %v1805_v44, 0.0  ;;  %v1971_v34 = vmax.f32 %v1969_v26, %v1970_v49 }
 0x360   :  { %v1678_v27 = vpop.f32.mrf.mxu2 }
 0x361   :  { %v1871_v5 = vmul.f32 %v2466_v0, %v1837_v22  ;;  %v1679_v37 = vadd.f32 %v1678_v27, %v1589_v48  ;;  %v2040_v62 = vsel %vm2030_vm12, %v1971_v34, %v2039_v59 }
 0x363   :  { %v1972_v58 = vmax.f32 %v1870_v25, %v1871_v5  ;;  %v1768_v42 = vadd.f32 %v1767_v60, %v1679_v37  ;;  %v1591_v50 = vpop.f32.mrf.mxu1 }
 0x365   :  { %v1973_v41 = vrot.slane %v1972_v58, 4  ;;  %v1806_v23 = vadd.f32 %v2465_v1, %v1768_v42 }
 0x367   :  { %v1974_v55 = vmax.f32 %v1972_v58, %v1973_v41  ;;  %v1838_v46 = vmax.f32 %v1806_v23, 0.0 }
 0x368   :  { %v1680_v30 = vpop.f32.mrf.mxu2 }
 0x369   :  { %v1681_v52 = vadd.f32 %v1680_v30, %v1591_v50  ;;  %v1975_v36 = vrot.slane %v1974_v55, 2  ;;  %v1872_v33 = vmul.f32 %v2467_v4, %v1838_v46 }
 0x36b   :  { %v1770_v47 = vadd.f32 %v1769_v31, %v1681_v52  ;;  %v1976_v43 = vmax.f32 %v1974_v55, %v1975_v36 }
 0x36d   :  { %v1807_v53 = vadd.f32 %v2465_v1, %v1770_v47  ;;  %v1977_v18 = vrot.slane %v1976_v43, 1 }
 0x36f   :  { %v1839_v20 = vmax.f32 %v1807_v53, 0.0  ;;  %v1978_v1 = vmax.f32 %v1976_v43, %v1977_v18 }
 0x371   :  { %v1873_v39 = vmul.f32 %v2466_v0, %v1839_v20  ;;  %v2041_v3 = vsel %vm2032_vm13, %v1978_v1, %v2040_v62 }
 0x373   :  { %v1979_v6 = vmax.f32 %v1872_v33, %v1873_v39 }
 0x375   :  { %v1980_v7 = vrot.slane %v1979_v6, 4 }
 0x377   :  { %v1981_v54 = vmax.f32 %v1979_v6, %v1980_v7 }
 0x379   :  { %v1982_v56 = vrot.slane %v1981_v54, 2 }
 0x37b   :  { %v1983_v57 = vmax.f32 %v1981_v54, %v1982_v56 }
 0x37d   :  { %v1984_v21 = vrot.slane %v1983_v57, 1 }
 0x37f   :  { %v1985_v35 = vmax.f32 %v1983_v57, %v1984_v21 }
 0x381   :  { %v2042_v8 = vsel %vm2034_vm15, %v1985_v35, %v2041_v3 }
 0x382   :  { %2064 = vmatmul.f32.gmra.mxu0 %v2042_v8 }
 0x3ff   :  { %v2065_v11 = vpop.f32.mrf.mxu0 }
 0x400   :  { %v2066_v10 = vadd.f32 %v3476_v45, %v2065_v11 }
 0x402   :  { %2069 = vst [vmem:[#allocation11 + $0x8] sm:$0xff] %v2066_v10 }
 0x403   :  { %2082 = dma.vmem_to_hbm [thread:$0]  %s2075_s30, 256, %s2077_s12, [#allocation4], %s2621_s9, %s2621_s9, %s2622_s10  }
 0x404   :  { %2618 = dma.done.wait [#allocation4], 256  }
 0x405   :  { %2619 = vsyncadd [#allocation4], 4294967040 }
 0x406   :  { %2087 = vsyncpa [#allocation3], 1 }
 0x407   :  { %2088 = vsyncpa [#allocation6], 1 }
 0x408   :  { %2089 = vsyncpa [#allocation9], 1 }
 0x409   :  { %2090 = vsyncpa [#allocation4], 1 }

</bundles_post_ra>
